<compile_context>
chip_gen: v5e
topology: v5e:2x2
jax: 0.10.0
libtpu: 0.0.40
codegen_flags: <defaults>
</compile_context>

<pallas_src>
import functools
import math

import jax
import jax.numpy as jnp
from jax.experimental import pallas as pl
from jax.experimental.pallas import tpu as pltpu  # noqa: F401  (TPU backend)

LN_EPS = 1e-5        # PyTorch LayerNorm default
NEG_BIG = -1e30      # finite "masked" additive bias (avoids -inf -> NaN)


def _layernorm(v, w, b=None, eps=LN_EPS):
    mu = jnp.mean(v, axis=-1, keepdims=True)
    var = jnp.mean((v - mu) ** 2, axis=-1, keepdims=True)
    y = (v - mu) * jax.lax.rsqrt(var + eps) * w
    if b is not None:
        y = y + b
    return y


def _softmax_last(s):
    m = jnp.max(s, axis=-1, keepdims=True)
    e = jnp.exp(s - m)
    return e / jnp.sum(e, axis=-1, keepdims=True)


# ---------------------------------------------------------------------------
# Single fused kernel: (pre-fused) input projection + PE, L pre-norm bias-free
# TransformerEncoderLayers, final norm, avg-pool, cls head.
# No grid: the whole problem (<1 MiB of weights + activations) lives in VMEM.
# ---------------------------------------------------------------------------
def fused_forward_kernel(re_ref, te_ref, oe_ref, pe_ref, kbias_ref,
                         ln1_ref, wqkv_ref, wo_ref, ln2_ref, w1_ref, w2_ref,
                         encw_ref, encb_ref, clslnw_ref, clslnb_ref,
                         wc_ref, bc_ref, logits_ref, *, nhead, num_layers):
    B, S, D = re_ref.shape
    H = nhead
    dh = D // H
    scale = 1.0 / math.sqrt(dh)

    # --- input projection (tables already carry linear_map) + bias + PE -----
    x3 = (re_ref[...] + te_ref[...] + oe_ref[...]).astype(jnp.float32)
    x3 = x3 + pe_ref[...]                          # (B,S,D) + (S,D); PE carries b_map
    x = x3.reshape(B * S, D)                       # fold batch into sublanes
    kbias = kbias_ref[...]                         # (B, S) additive key bias

    # --- encoder layers (static unroll; weights stacked on leading L axis) --
    for l in range(num_layers):
        # self-attention sub-block (pre-norm)
        xn = _layernorm(x, ln1_ref[l])                               # (B*S, D)
        qkv = jnp.dot(xn, wqkv_ref[l],
                      preferred_element_type=jnp.float32)            # (B*S, 3D)
        wo_l = wo_ref[l]                                             # (D, D) (in,out)
        attn = jnp.zeros((B * S, D), jnp.float32)
        for h in range(H):                          # static head loop, B-batched
            lo, hi = h * dh, (h + 1) * dh
            qh = qkv[:, lo:hi].reshape(B, S, dh)
            kh = qkv[:, D + lo:D + hi].reshape(B, S, dh)
            vh = qkv[:, 2 * D + lo:2 * D + hi].reshape(B, S, dh)
            s = jnp.einsum('bqd,bkd->bqk', qh, kh,
                           preferred_element_type=jnp.float32) * scale
            s = s + kbias[:, None, :]               # (B,S,S) + (B,1,S)
            p = _softmax_last(s)
            ctx = jnp.einsum('bqk,bkd->bqd', p, vh,
                             preferred_element_type=jnp.float32)
            # accumulate the output projection per head (avoids lane concat)
            attn = attn + jnp.dot(ctx.reshape(B * S, dh), wo_l[lo:hi, :],
                                  preferred_element_type=jnp.float32)
        x = x + attn

        # feed-forward sub-block (pre-norm)
        xn2 = _layernorm(x, ln2_ref[l])
        hmid = jax.nn.relu(jnp.dot(xn2, w1_ref[l],
                                   preferred_element_type=jnp.float32))
        x = x + jnp.dot(hmid, w2_ref[l], preferred_element_type=jnp.float32)

    # --- final encoder norm -> AvgPool over S -> cls head (LN + Linear) -----
    xn = _layernorm(x, encw_ref[...], encb_ref[...])                 # (B*S, D)
    pooled = jnp.mean(xn.reshape(B, S, D), axis=1)                   # (B, D)
    hc = _layernorm(pooled, clslnw_ref[...], clslnb_ref[...])
    logits = jnp.dot(hc, wc_ref[...],
                     preferred_element_type=jnp.float32) + bc_ref[...]
    logits_ref[...] = logits.astype(logits_ref.dtype)


# ---------------------------------------------------------------------------
# Host-side parameter construction (pre-transposition / pre-fusion).
# ---------------------------------------------------------------------------
def sinusoid_pe(max_len, d):
    pos = jnp.arange(max_len, dtype=jnp.float32)[:, None]
    div = jnp.exp(jnp.arange(0, d, 2, dtype=jnp.float32) * (-math.log(10000.0) / d))
    pe = jnp.zeros((max_len, d), jnp.float32)
    pe = pe.at[:, 0::2].set(jnp.sin(pos * div))
    pe = pe.at[:, 1::2].set(jnp.cos(pos * div))
    return pe


def init_params(key, cfg):
    keys = iter(jax.random.split(key, 128))

    def nrm(shape, scale=0.02):
        return (scale * jax.random.normal(next(keys), shape)).astype(jnp.float32)

    D = cfg["d_model"]
    F = cfg["mlp_scaler"] * D
    L = cfg["num_encoder_layers"]
    pad = cfg["pad_idx"]

    emb = {}
    for name in ("rhyme", "tone", "onset"):
        e = nrm((cfg["vocab_sizes"][name], D))
        emb[name] = e.at[pad].set(0.0)          # padding_idx row zeroed

    # linear_map in PyTorch layout: W:(D, 3D), applied to cat(rhyme, tone, onset)
    w_map = nrm((D, 3 * D))
    b_map = nrm((1, D))
    # Pre-fold linear_map into the embedding tables: table = emb @ W_block.T
    tab_rhyme = emb["rhyme"] @ w_map[:, 0 * D:1 * D].T
    tab_tone = emb["tone"] @ w_map[:, 1 * D:2 * D].T
    tab_onset = emb["onset"] @ w_map[:, 2 * D:3 * D].T
    # (pad rows remain zero, so semantics are unchanged)

    ln1, ln2, wqkv_t, wo_t, w1_t, w2_t = [], [], [], [], [], []
    for _ in range(L):
        wq, wk, wv, wo = nrm((D, D)), nrm((D, D)), nrm((D, D)), nrm((D, D))
        w1, w2 = nrm((F, D)), nrm((D, F))
        ln1.append(jnp.ones((1, D), jnp.float32))
        ln2.append(jnp.ones((1, D), jnp.float32))
        wqkv_t.append(jnp.concatenate([wq.T, wk.T, wv.T], axis=1))  # (D, 3D)
        wo_t.append(wo.T)                                           # (D, D)
        w1_t.append(w1.T)                                           # (D, F)
        w2_t.append(w2.T)                                           # (F, D)

    cls_w = nrm((cfg["num_output"], D))

    return dict(
        tab_rhyme=tab_rhyme, tab_tone=tab_tone, tab_onset=tab_onset,
        b_map=b_map,
        pe=sinusoid_pe(cfg["max_seq_len"], D),
        ln1=jnp.stack(ln1), ln2=jnp.stack(ln2),          # (L, 1, D)
        wqkv_t=jnp.stack(wqkv_t), wo_t=jnp.stack(wo_t),  # (L, D, 3D), (L, D, D)
        w1_t=jnp.stack(w1_t), w2_t=jnp.stack(w2_t),      # (L, D, F), (L, F, D)
        enc_norm_w=jnp.ones((1, D), jnp.float32),
        enc_norm_b=jnp.zeros((1, D), jnp.float32),
        cls_ln_w=jnp.ones((1, D), jnp.float32),
        cls_ln_b=jnp.zeros((1, D), jnp.float32),
        cls_w_t=cls_w.T,                                 # (D, num_output)
        cls_b=nrm((1, cfg["num_output"])),
    )


def _embed_and_mask(tokens, params, cfg):
    pad = cfg["pad_idx"]
    onset = tokens[:, :, 0]
    tone = tokens[:, :, 1]
    rhyme = tokens[:, :, 2]

    # TODO(synk): generate_padding_mask source unavailable; a position counts as
    # padding when all three sub-token ids equal pad_idx.
    pad_mask = jnp.all(tokens == pad, axis=-1)                         # (B, S)
    kbias = jnp.where(pad_mask, NEG_BIG, 0.0).astype(jnp.float32)      # finite

    # Embedding gathers (tables already carry linear_map's projection).
    re = jnp.take(params["tab_rhyme"], rhyme, axis=0)                  # (B, S, D)
    te = jnp.take(params["tab_tone"], tone, axis=0)
    oe = jnp.take(params["tab_onset"], onset, axis=0)

    S = tokens.shape[1]
    pe_plus = params["pe"][:S] + params["b_map"]       # fold linear_map bias in
    return re, te, oe, pe_plus, kbias


def forward(tokens, params, cfg):
    re, te, oe, pe_plus, kbias = _embed_and_mask(tokens, params, cfg)
    B = tokens.shape[0]

    kernel = functools.partial(
        fused_forward_kernel,
        nhead=cfg["nhead"],
        num_layers=cfg["num_encoder_layers"],
    )
    logits = pl.pallas_call(
        kernel,
        out_shape=jax.ShapeDtypeStruct((B, cfg["num_output"]), jnp.float32),
    )(re, te, oe, pe_plus, kbias,
      params["ln1"], params["wqkv_t"], params["wo_t"],
      params["ln2"], params["w1_t"], params["w2_t"],
      params["enc_norm_w"], params["enc_norm_b"],
      params["cls_ln_w"], params["cls_ln_b"],
      params["cls_w_t"], params["cls_b"])
    return logits


# Pure-JAX reference (same folded params, same math) for a sanity check.
def forward_ref(tokens, params, cfg):
    re, te, oe, pe_plus, kbias = _embed_and_mask(tokens, params, cfg)
    B, S, _ = re.shape
    D = cfg["d_model"]
    H = cfg["nhead"]
    dh = D // H
    scale = 1.0 / math.sqrt(dh)

    x = (re + te + oe + pe_plus).reshape(B * S, D)
    for l in range(cfg["num_encoder_layers"]):
        xn = _layernorm(x, params["ln1"][l])
        qkv = xn @ params["wqkv_t"][l]
        wo_l = params["wo_t"][l]
        attn = jnp.zeros((B * S, D), jnp.float32)
        for h in range(H):
            lo, hi = h * dh, (h + 1) * dh
            qh = qkv[:, lo:hi].reshape(B, S, dh)
            kh = qkv[:, D + lo:D + hi].reshape(B, S, dh)
            vh = qkv[:, 2 * D + lo:2 * D + hi].reshape(B, S, dh)
            s = jnp.einsum('bqd,bkd->bqk', qh, kh) * scale + kbias[:, None, :]
            p = _softmax_last(s)
            ctx = jnp.einsum('bqk,bkd->bqd', p, vh)
            attn = attn + ctx.reshape(B * S, dh) @ wo_l[lo:hi, :]
        x = x + attn
        xn2 = _layernorm(x, params["ln2"][l])
        x = x + jax.nn.relu(xn2 @ params["w1_t"][l]) @ params["w2_t"][l]

    xn = _layernorm(x, params["enc_norm_w"], params["enc_norm_b"])
    pooled = jnp.mean(xn.reshape(B, S, D), axis=1)
    hc = _layernorm(pooled, params["cls_ln_w"], params["cls_ln_b"])
    return hc @ params["cls_w_t"] + params["cls_b"]


if __name__ == "__main__":
    cfg = dict(
        d_model=32, nhead=4, num_encoder_layers=2, mlp_scaler=2,
        num_output=4, max_seq_len=16, pad_idx=0,
        vocab_sizes=dict(onset=11, tone=7, rhyme=13),
    )
    key = jax.random.PRNGKey(0)
    pkey, dkey = jax.random.split(key)
    params = init_params(pkey, cfg)

    B, S = 2, 8
    tok = jnp.stack(
        [
            jax.random.randint(jax.random.fold_in(dkey, 0), (B, S), 1, cfg["vocab_sizes"]["onset"]),
            jax.random.randint(jax.random.fold_in(dkey, 1), (B, S), 1, cfg["vocab_sizes"]["tone"]),
            jax.random.randint(jax.random.fold_in(dkey, 2), (B, S), 1, cfg["vocab_sizes"]["rhyme"]),
        ],
        axis=-1,
    ).astype(jnp.int32)
    # pad out the tail of the second sequence to exercise the key-padding mask
    tok = tok.at[1, 6:, :].set(cfg["pad_idx"])

    fwd = jax.jit(functools.partial(forward, cfg=cfg))
    logits = fwd(tok, params)
    jax.block_until_ready(logits)

    assert logits.shape == (B, cfg["num_output"])
    assert bool(jnp.all(jnp.isfinite(logits)))

    ref = forward_ref(tok, params, cfg)
    assert bool(jnp.allclose(logits, ref, rtol=5e-2, atol=5e-2))

    print("KERNEL_OK")
</pallas_src>

<mosaic_0001>
module attributes {stable_mosaic.version = 11 : i64} {
  func.func @fused_forward_kernel(%arg0: memref<2x8x32xf32, #tpu.memory_space<vmem>>, %arg1: memref<2x8x32xf32, #tpu.memory_space<vmem>>, %arg2: memref<2x8x32xf32, #tpu.memory_space<vmem>>, %arg3: memref<8x32xf32, #tpu.memory_space<vmem>>, %arg4: memref<2x8xf32, #tpu.memory_space<vmem>>, %arg5: memref<2x1x32xf32, #tpu.memory_space<vmem>>, %arg6: memref<2x32x96xf32, #tpu.memory_space<vmem>>, %arg7: memref<2x32x32xf32, #tpu.memory_space<vmem>>, %arg8: memref<2x1x32xf32, #tpu.memory_space<vmem>>, %arg9: memref<2x32x64xf32, #tpu.memory_space<vmem>>, %arg10: memref<2x64x32xf32, #tpu.memory_space<vmem>>, %arg11: memref<1x32xf32, #tpu.memory_space<vmem>>, %arg12: memref<1x32xf32, #tpu.memory_space<vmem>>, %arg13: memref<1x32xf32, #tpu.memory_space<vmem>>, %arg14: memref<1x32xf32, #tpu.memory_space<vmem>>, %arg15: memref<32x4xf32, #tpu.memory_space<vmem>>, %arg16: memref<1x4xf32, #tpu.memory_space<vmem>>, %arg17: memref<2x4xf32, #tpu.memory_space<vmem>>) attributes {dimension_semantics = [], scalar_prefetch = 0 : i64, scratch_operands = 0 : i64, tpu.core_type = #tpu.core_type<tc>} {
    %c0 = arith.constant 0 : index
    %c0_0 = arith.constant 0 : index
    %c0_1 = arith.constant 0 : index
    %0 = vector.load %arg0[%c0, %c0_0, %c0_1] : memref<2x8x32xf32, #tpu.memory_space<vmem>>, vector<2x8x32xf32>
    %c0_2 = arith.constant 0 : index
    %c0_3 = arith.constant 0 : index
    %c0_4 = arith.constant 0 : index
    %1 = vector.load %arg1[%c0_2, %c0_3, %c0_4] : memref<2x8x32xf32, #tpu.memory_space<vmem>>, vector<2x8x32xf32>
    %2 = arith.addf %0, %1 : vector<2x8x32xf32>
    %c0_5 = arith.constant 0 : index
    %c0_6 = arith.constant 0 : index
    %c0_7 = arith.constant 0 : index
    %3 = vector.load %arg2[%c0_5, %c0_6, %c0_7] : memref<2x8x32xf32, #tpu.memory_space<vmem>>, vector<2x8x32xf32>
    %4 = arith.addf %2, %3 : vector<2x8x32xf32>
    %c0_8 = arith.constant 0 : index
    %c0_9 = arith.constant 0 : index
    %5 = vector.load %arg3[%c0_8, %c0_9] : memref<8x32xf32, #tpu.memory_space<vmem>>, vector<8x32xf32>
    %6 = vector.shape_cast %5 : vector<8x32xf32> to vector<1x8x32xf32>
    %7 = vector.broadcast %6 : vector<1x8x32xf32> to vector<2x8x32xf32>
    %8 = arith.addf %4, %7 : vector<2x8x32xf32>
    %9 = vector.shape_cast %8 : vector<2x8x32xf32> to vector<16x32xf32>
    %c0_10 = arith.constant 0 : index
    %c0_11 = arith.constant 0 : index
    %10 = vector.load %arg4[%c0_10, %c0_11] : memref<2x8xf32, #tpu.memory_space<vmem>>, vector<2x8xf32>
    %c0_12 = arith.constant 0 : index
    %c0_13 = arith.constant 0 : index
    %c0_14 = arith.constant 0 : index
    %11 = vector.load %arg5[%c0_12, %c0_13, %c0_14] : memref<2x1x32xf32, #tpu.memory_space<vmem>>, vector<1x1x32xf32>
    %12 = vector.shape_cast %11 : vector<1x1x32xf32> to vector<1x32xf32>
    %cst = arith.constant dense<0.000000e+00> : vector<16xf32>
    %13 = vector.multi_reduction <add>, %9, %cst [1] : vector<16x32xf32> to vector<16xf32>
    %14 = vector.shape_cast %13 : vector<16xf32> to vector<16x1xf32>
    %cst_15 = arith.constant 3.200000e+01 : f32
    %15 = vector.broadcast %cst_15 : f32 to vector<16x1xf32>
    %16 = arith.divf %14, %15 : vector<16x1xf32>
    %17 = vector.broadcast %16 : vector<16x1xf32> to vector<16x32xf32>
    %18 = arith.subf %9, %17 : vector<16x32xf32>
    %19 = arith.mulf %18, %18 : vector<16x32xf32>
    %cst_16 = arith.constant dense<0.000000e+00> : vector<16xf32>
    %20 = vector.multi_reduction <add>, %19, %cst_16 [1] : vector<16x32xf32> to vector<16xf32>
    %21 = vector.shape_cast %20 : vector<16xf32> to vector<16x1xf32>
    %cst_17 = arith.constant 3.200000e+01 : f32
    %22 = vector.broadcast %cst_17 : f32 to vector<16x1xf32>
    %23 = arith.divf %21, %22 : vector<16x1xf32>
    %24 = vector.broadcast %16 : vector<16x1xf32> to vector<16x32xf32>
    %25 = arith.subf %9, %24 : vector<16x32xf32>
    %cst_18 = arith.constant 9.99999974E-6 : f32
    %26 = vector.broadcast %cst_18 : f32 to vector<16x1xf32>
    %27 = arith.addf %23, %26 : vector<16x1xf32>
    %28 = math.rsqrt %27 : vector<16x1xf32>
    %29 = vector.broadcast %28 : vector<16x1xf32> to vector<16x32xf32>
    %30 = arith.mulf %25, %29 : vector<16x32xf32>
    %31 = vector.broadcast %12 : vector<1x32xf32> to vector<16x32xf32>
    %32 = arith.mulf %30, %31 : vector<16x32xf32>
    %c0_19 = arith.constant 0 : index
    %c0_20 = arith.constant 0 : index
    %c0_21 = arith.constant 0 : index
    %33 = vector.load %arg6[%c0_19, %c0_20, %c0_21] : memref<2x32x96xf32, #tpu.memory_space<vmem>>, vector<1x32x96xf32>
    %34 = vector.shape_cast %33 : vector<1x32x96xf32> to vector<32x96xf32>
    %cst_22 = arith.constant dense<0.000000e+00> : vector<16x96xf32>
    %35 = tpu.matmul %32, %34, %cst_22 {dimension_numbers = #tpu.dot_dimension_numbers<[1], [0], [0], [1], [0, 0, 1, 1], [], []>} : vector<16x32xf32>, vector<32x96xf32>, vector<16x96xf32> -> vector<16x96xf32>
    %c0_23 = arith.constant 0 : index
    %c0_24 = arith.constant 0 : index
    %c0_25 = arith.constant 0 : index
    %36 = vector.load %arg7[%c0_23, %c0_24, %c0_25] : memref<2x32x32xf32, #tpu.memory_space<vmem>>, vector<1x32x32xf32>
    %37 = vector.shape_cast %36 : vector<1x32x32xf32> to vector<32x32xf32>
    %cst_26 = arith.constant 0.000000e+00 : f32
    %38 = vector.broadcast %cst_26 : f32 to vector<16x32xf32>
    %39 = vector.extract_strided_slice %35 {offsets = [0, 0], sizes = [16, 8], strides = [1, 1]} : vector<16x96xf32> to vector<16x8xf32>
    %40 = vector.shape_cast %39 : vector<16x8xf32> to vector<2x8x8xf32>
    %41 = vector.extract_strided_slice %35 {offsets = [0, 32], sizes = [16, 8], strides = [1, 1]} : vector<16x96xf32> to vector<16x8xf32>
    %42 = vector.shape_cast %41 : vector<16x8xf32> to vector<2x8x8xf32>
    %43 = vector.extract_strided_slice %35 {offsets = [0, 64], sizes = [16, 8], strides = [1, 1]} : vector<16x96xf32> to vector<16x8xf32>
    %44 = vector.shape_cast %43 : vector<16x8xf32> to vector<2x8x8xf32>
    "tpu.trace_start"() <{level = 10 : i32, message = "bqd,bkd->bqk"}> : () -> ()
    %cst_27 = arith.constant dense<0.000000e+00> : vector<2x8x8xf32>
    %45 = tpu.matmul %40, %42, %cst_27 {dimension_numbers = #tpu.dot_dimension_numbers<[2], [2], [1], [1], [0, 0, 0, 1, 1, 1], [0], [0]>} : vector<2x8x8xf32>, vector<2x8x8xf32>, vector<2x8x8xf32> -> vector<2x8x8xf32>
    "tpu.trace_stop"() : () -> ()
    %cst_28 = arith.constant 0.353553385 : f32
    %46 = vector.broadcast %cst_28 : f32 to vector<2x8x8xf32>
    %47 = arith.mulf %45, %46 : vector<2x8x8xf32>
    %48 = vector.shape_cast %10 : vector<2x8xf32> to vector<2x1x8xf32>
    %49 = vector.broadcast %48 : vector<2x1x8xf32> to vector<2x8x8xf32>
    %50 = arith.addf %47, %49 : vector<2x8x8xf32>
    %cst_29 = arith.constant dense<0xFF800000> : vector<2x8xf32>
    %51 = vector.multi_reduction <maximumf>, %50, %cst_29 [2] : vector<2x8x8xf32> to vector<2x8xf32>
    %52 = vector.shape_cast %51 : vector<2x8xf32> to vector<2x8x1xf32>
    %53 = vector.broadcast %52 : vector<2x8x1xf32> to vector<2x8x8xf32>
    %54 = arith.subf %50, %53 : vector<2x8x8xf32>
    %55 = math.exp %54 : vector<2x8x8xf32>
    %cst_30 = arith.constant dense<0.000000e+00> : vector<2x8xf32>
    %56 = vector.multi_reduction <add>, %55, %cst_30 [2] : vector<2x8x8xf32> to vector<2x8xf32>
    %57 = vector.shape_cast %56 : vector<2x8xf32> to vector<2x8x1xf32>
    %58 = vector.broadcast %57 : vector<2x8x1xf32> to vector<2x8x8xf32>
    %59 = arith.divf %55, %58 : vector<2x8x8xf32>
    "tpu.trace_start"() <{level = 10 : i32, message = "bqk,bkd->bqd"}> : () -> ()
    %cst_31 = arith.constant dense<0.000000e+00> : vector<2x8x8xf32>
    %60 = tpu.matmul %59, %44, %cst_31 {dimension_numbers = #tpu.dot_dimension_numbers<[2], [1], [1], [2], [0, 0, 0, 1, 1, 2], [0], [0]>} : vector<2x8x8xf32>, vector<2x8x8xf32>, vector<2x8x8xf32> -> vector<2x8x8xf32>
    "tpu.trace_stop"() : () -> ()
    %61 = vector.shape_cast %60 : vector<2x8x8xf32> to vector<16x8xf32>
    %62 = vector.extract_strided_slice %37 {offsets = [0, 0], sizes = [8, 32], strides = [1, 1]} : vector<32x32xf32> to vector<8x32xf32>
    %cst_32 = arith.constant dense<0.000000e+00> : vector<16x32xf32>
    %63 = tpu.matmul %61, %62, %cst_32 {dimension_numbers = #tpu.dot_dimension_numbers<[1], [0], [0], [1], [0, 0, 1, 1], [], []>} : vector<16x8xf32>, vector<8x32xf32>, vector<16x32xf32> -> vector<16x32xf32>
    %64 = arith.addf %38, %63 : vector<16x32xf32>
    %65 = vector.extract_strided_slice %35 {offsets = [0, 8], sizes = [16, 8], strides = [1, 1]} : vector<16x96xf32> to vector<16x8xf32>
    %66 = vector.shape_cast %65 : vector<16x8xf32> to vector<2x8x8xf32>
    %67 = vector.extract_strided_slice %35 {offsets = [0, 40], sizes = [16, 8], strides = [1, 1]} : vector<16x96xf32> to vector<16x8xf32>
    %68 = vector.shape_cast %67 : vector<16x8xf32> to vector<2x8x8xf32>
    %69 = vector.extract_strided_slice %35 {offsets = [0, 72], sizes = [16, 8], strides = [1, 1]} : vector<16x96xf32> to vector<16x8xf32>
    %70 = vector.shape_cast %69 : vector<16x8xf32> to vector<2x8x8xf32>
    "tpu.trace_start"() <{level = 10 : i32, message = "bqd,bkd->bqk"}> : () -> ()
    %cst_33 = arith.constant dense<0.000000e+00> : vector<2x8x8xf32>
    %71 = tpu.matmul %66, %68, %cst_33 {dimension_numbers = #tpu.dot_dimension_numbers<[2], [2], [1], [1], [0, 0, 0, 1, 1, 1], [0], [0]>} : vector<2x8x8xf32>, vector<2x8x8xf32>, vector<2x8x8xf32> -> vector<2x8x8xf32>
    "tpu.trace_stop"() : () -> ()
    %cst_34 = arith.constant 0.353553385 : f32
    %72 = vector.broadcast %cst_34 : f32 to vector<2x8x8xf32>
    %73 = arith.mulf %71, %72 : vector<2x8x8xf32>
    %74 = vector.shape_cast %10 : vector<2x8xf32> to vector<2x1x8xf32>
    %75 = vector.broadcast %74 : vector<2x1x8xf32> to vector<2x8x8xf32>
    %76 = arith.addf %73, %75 : vector<2x8x8xf32>
    %cst_35 = arith.constant dense<0xFF800000> : vector<2x8xf32>
    %77 = vector.multi_reduction <maximumf>, %76, %cst_35 [2] : vector<2x8x8xf32> to vector<2x8xf32>
    %78 = vector.shape_cast %77 : vector<2x8xf32> to vector<2x8x1xf32>
    %79 = vector.broadcast %78 : vector<2x8x1xf32> to vector<2x8x8xf32>
    %80 = arith.subf %76, %79 : vector<2x8x8xf32>
    %81 = math.exp %80 : vector<2x8x8xf32>
    %cst_36 = arith.constant dense<0.000000e+00> : vector<2x8xf32>
    %82 = vector.multi_reduction <add>, %81, %cst_36 [2] : vector<2x8x8xf32> to vector<2x8xf32>
    %83 = vector.shape_cast %82 : vector<2x8xf32> to vector<2x8x1xf32>
    %84 = vector.broadcast %83 : vector<2x8x1xf32> to vector<2x8x8xf32>
    %85 = arith.divf %81, %84 : vector<2x8x8xf32>
    "tpu.trace_start"() <{level = 10 : i32, message = "bqk,bkd->bqd"}> : () -> ()
    %cst_37 = arith.constant dense<0.000000e+00> : vector<2x8x8xf32>
    %86 = tpu.matmul %85, %70, %cst_37 {dimension_numbers = #tpu.dot_dimension_numbers<[2], [1], [1], [2], [0, 0, 0, 1, 1, 2], [0], [0]>} : vector<2x8x8xf32>, vector<2x8x8xf32>, vector<2x8x8xf32> -> vector<2x8x8xf32>
    "tpu.trace_stop"() : () -> ()
    %87 = vector.shape_cast %86 : vector<2x8x8xf32> to vector<16x8xf32>
    %88 = vector.extract_strided_slice %37 {offsets = [8, 0], sizes = [8, 32], strides = [1, 1]} : vector<32x32xf32> to vector<8x32xf32>
    %cst_38 = arith.constant dense<0.000000e+00> : vector<16x32xf32>
    %89 = tpu.matmul %87, %88, %cst_38 {dimension_numbers = #tpu.dot_dimension_numbers<[1], [0], [0], [1], [0, 0, 1, 1], [], []>} : vector<16x8xf32>, vector<8x32xf32>, vector<16x32xf32> -> vector<16x32xf32>
    %90 = arith.addf %64, %89 : vector<16x32xf32>
    %91 = vector.extract_strided_slice %35 {offsets = [0, 16], sizes = [16, 8], strides = [1, 1]} : vector<16x96xf32> to vector<16x8xf32>
    %92 = vector.shape_cast %91 : vector<16x8xf32> to vector<2x8x8xf32>
    %93 = vector.extract_strided_slice %35 {offsets = [0, 48], sizes = [16, 8], strides = [1, 1]} : vector<16x96xf32> to vector<16x8xf32>
    %94 = vector.shape_cast %93 : vector<16x8xf32> to vector<2x8x8xf32>
    %95 = vector.extract_strided_slice %35 {offsets = [0, 80], sizes = [16, 8], strides = [1, 1]} : vector<16x96xf32> to vector<16x8xf32>
    %96 = vector.shape_cast %95 : vector<16x8xf32> to vector<2x8x8xf32>
    "tpu.trace_start"() <{level = 10 : i32, message = "bqd,bkd->bqk"}> : () -> ()
    %cst_39 = arith.constant dense<0.000000e+00> : vector<2x8x8xf32>
    %97 = tpu.matmul %92, %94, %cst_39 {dimension_numbers = #tpu.dot_dimension_numbers<[2], [2], [1], [1], [0, 0, 0, 1, 1, 1], [0], [0]>} : vector<2x8x8xf32>, vector<2x8x8xf32>, vector<2x8x8xf32> -> vector<2x8x8xf32>
    "tpu.trace_stop"() : () -> ()
    %cst_40 = arith.constant 0.353553385 : f32
    %98 = vector.broadcast %cst_40 : f32 to vector<2x8x8xf32>
    %99 = arith.mulf %97, %98 : vector<2x8x8xf32>
    %100 = vector.shape_cast %10 : vector<2x8xf32> to vector<2x1x8xf32>
    %101 = vector.broadcast %100 : vector<2x1x8xf32> to vector<2x8x8xf32>
    %102 = arith.addf %99, %101 : vector<2x8x8xf32>
    %cst_41 = arith.constant dense<0xFF800000> : vector<2x8xf32>
    %103 = vector.multi_reduction <maximumf>, %102, %cst_41 [2] : vector<2x8x8xf32> to vector<2x8xf32>
    %104 = vector.shape_cast %103 : vector<2x8xf32> to vector<2x8x1xf32>
    %105 = vector.broadcast %104 : vector<2x8x1xf32> to vector<2x8x8xf32>
    %106 = arith.subf %102, %105 : vector<2x8x8xf32>
    %107 = math.exp %106 : vector<2x8x8xf32>
    %cst_42 = arith.constant dense<0.000000e+00> : vector<2x8xf32>
    %108 = vector.multi_reduction <add>, %107, %cst_42 [2] : vector<2x8x8xf32> to vector<2x8xf32>
    %109 = vector.shape_cast %108 : vector<2x8xf32> to vector<2x8x1xf32>
    %110 = vector.broadcast %109 : vector<2x8x1xf32> to vector<2x8x8xf32>
    %111 = arith.divf %107, %110 : vector<2x8x8xf32>
    "tpu.trace_start"() <{level = 10 : i32, message = "bqk,bkd->bqd"}> : () -> ()
    %cst_43 = arith.constant dense<0.000000e+00> : vector<2x8x8xf32>
    %112 = tpu.matmul %111, %96, %cst_43 {dimension_numbers = #tpu.dot_dimension_numbers<[2], [1], [1], [2], [0, 0, 0, 1, 1, 2], [0], [0]>} : vector<2x8x8xf32>, vector<2x8x8xf32>, vector<2x8x8xf32> -> vector<2x8x8xf32>
    "tpu.trace_stop"() : () -> ()
    %113 = vector.shape_cast %112 : vector<2x8x8xf32> to vector<16x8xf32>
    %114 = vector.extract_strided_slice %37 {offsets = [16, 0], sizes = [8, 32], strides = [1, 1]} : vector<32x32xf32> to vector<8x32xf32>
    %cst_44 = arith.constant dense<0.000000e+00> : vector<16x32xf32>
    %115 = tpu.matmul %113, %114, %cst_44 {dimension_numbers = #tpu.dot_dimension_numbers<[1], [0], [0], [1], [0, 0, 1, 1], [], []>} : vector<16x8xf32>, vector<8x32xf32>, vector<16x32xf32> -> vector<16x32xf32>
    %116 = arith.addf %90, %115 : vector<16x32xf32>
    %117 = vector.extract_strided_slice %35 {offsets = [0, 24], sizes = [16, 8], strides = [1, 1]} : vector<16x96xf32> to vector<16x8xf32>
    %118 = vector.shape_cast %117 : vector<16x8xf32> to vector<2x8x8xf32>
    %119 = vector.extract_strided_slice %35 {offsets = [0, 56], sizes = [16, 8], strides = [1, 1]} : vector<16x96xf32> to vector<16x8xf32>
    %120 = vector.shape_cast %119 : vector<16x8xf32> to vector<2x8x8xf32>
    %121 = vector.extract_strided_slice %35 {offsets = [0, 88], sizes = [16, 8], strides = [1, 1]} : vector<16x96xf32> to vector<16x8xf32>
    %122 = vector.shape_cast %121 : vector<16x8xf32> to vector<2x8x8xf32>
    "tpu.trace_start"() <{level = 10 : i32, message = "bqd,bkd->bqk"}> : () -> ()
    %cst_45 = arith.constant dense<0.000000e+00> : vector<2x8x8xf32>
    %123 = tpu.matmul %118, %120, %cst_45 {dimension_numbers = #tpu.dot_dimension_numbers<[2], [2], [1], [1], [0, 0, 0, 1, 1, 1], [0], [0]>} : vector<2x8x8xf32>, vector<2x8x8xf32>, vector<2x8x8xf32> -> vector<2x8x8xf32>
    "tpu.trace_stop"() : () -> ()
    %cst_46 = arith.constant 0.353553385 : f32
    %124 = vector.broadcast %cst_46 : f32 to vector<2x8x8xf32>
    %125 = arith.mulf %123, %124 : vector<2x8x8xf32>
    %126 = vector.shape_cast %10 : vector<2x8xf32> to vector<2x1x8xf32>
    %127 = vector.broadcast %126 : vector<2x1x8xf32> to vector<2x8x8xf32>
    %128 = arith.addf %125, %127 : vector<2x8x8xf32>
    %cst_47 = arith.constant dense<0xFF800000> : vector<2x8xf32>
    %129 = vector.multi_reduction <maximumf>, %128, %cst_47 [2] : vector<2x8x8xf32> to vector<2x8xf32>
    %130 = vector.shape_cast %129 : vector<2x8xf32> to vector<2x8x1xf32>
    %131 = vector.broadcast %130 : vector<2x8x1xf32> to vector<2x8x8xf32>
    %132 = arith.subf %128, %131 : vector<2x8x8xf32>
    %133 = math.exp %132 : vector<2x8x8xf32>
    %cst_48 = arith.constant dense<0.000000e+00> : vector<2x8xf32>
    %134 = vector.multi_reduction <add>, %133, %cst_48 [2] : vector<2x8x8xf32> to vector<2x8xf32>
    %135 = vector.shape_cast %134 : vector<2x8xf32> to vector<2x8x1xf32>
    %136 = vector.broadcast %135 : vector<2x8x1xf32> to vector<2x8x8xf32>
    %137 = arith.divf %133, %136 : vector<2x8x8xf32>
    "tpu.trace_start"() <{level = 10 : i32, message = "bqk,bkd->bqd"}> : () -> ()
    %cst_49 = arith.constant dense<0.000000e+00> : vector<2x8x8xf32>
    %138 = tpu.matmul %137, %122, %cst_49 {dimension_numbers = #tpu.dot_dimension_numbers<[2], [1], [1], [2], [0, 0, 0, 1, 1, 2], [0], [0]>} : vector<2x8x8xf32>, vector<2x8x8xf32>, vector<2x8x8xf32> -> vector<2x8x8xf32>
    "tpu.trace_stop"() : () -> ()
    %139 = vector.shape_cast %138 : vector<2x8x8xf32> to vector<16x8xf32>
    %140 = vector.extract_strided_slice %37 {offsets = [24, 0], sizes = [8, 32], strides = [1, 1]} : vector<32x32xf32> to vector<8x32xf32>
    %cst_50 = arith.constant dense<0.000000e+00> : vector<16x32xf32>
    %141 = tpu.matmul %139, %140, %cst_50 {dimension_numbers = #tpu.dot_dimension_numbers<[1], [0], [0], [1], [0, 0, 1, 1], [], []>} : vector<16x8xf32>, vector<8x32xf32>, vector<16x32xf32> -> vector<16x32xf32>
    %142 = arith.addf %116, %141 : vector<16x32xf32>
    %143 = arith.addf %9, %142 : vector<16x32xf32>
    %c0_51 = arith.constant 0 : index
    %c0_52 = arith.constant 0 : index
    %c0_53 = arith.constant 0 : index
    %144 = vector.load %arg8[%c0_51, %c0_52, %c0_53] : memref<2x1x32xf32, #tpu.memory_space<vmem>>, vector<1x1x32xf32>
    %145 = vector.shape_cast %144 : vector<1x1x32xf32> to vector<1x32xf32>
    %cst_54 = arith.constant dense<0.000000e+00> : vector<16xf32>
    %146 = vector.multi_reduction <add>, %143, %cst_54 [1] : vector<16x32xf32> to vector<16xf32>
    %147 = vector.shape_cast %146 : vector<16xf32> to vector<16x1xf32>
    %cst_55 = arith.constant 3.200000e+01 : f32
    %148 = vector.broadcast %cst_55 : f32 to vector<16x1xf32>
    %149 = arith.divf %147, %148 : vector<16x1xf32>
    %150 = vector.broadcast %149 : vector<16x1xf32> to vector<16x32xf32>
    %151 = arith.subf %143, %150 : vector<16x32xf32>
    %152 = arith.mulf %151, %151 : vector<16x32xf32>
    %cst_56 = arith.constant dense<0.000000e+00> : vector<16xf32>
    %153 = vector.multi_reduction <add>, %152, %cst_56 [1] : vector<16x32xf32> to vector<16xf32>
    %154 = vector.shape_cast %153 : vector<16xf32> to vector<16x1xf32>
    %cst_57 = arith.constant 3.200000e+01 : f32
    %155 = vector.broadcast %cst_57 : f32 to vector<16x1xf32>
    %156 = arith.divf %154, %155 : vector<16x1xf32>
    %157 = vector.broadcast %149 : vector<16x1xf32> to vector<16x32xf32>
    %158 = arith.subf %143, %157 : vector<16x32xf32>
    %cst_58 = arith.constant 9.99999974E-6 : f32
    %159 = vector.broadcast %cst_58 : f32 to vector<16x1xf32>
    %160 = arith.addf %156, %159 : vector<16x1xf32>
    %161 = math.rsqrt %160 : vector<16x1xf32>
    %162 = vector.broadcast %161 : vector<16x1xf32> to vector<16x32xf32>
    %163 = arith.mulf %158, %162 : vector<16x32xf32>
    %164 = vector.broadcast %145 : vector<1x32xf32> to vector<16x32xf32>
    %165 = arith.mulf %163, %164 : vector<16x32xf32>
    %c0_59 = arith.constant 0 : index
    %c0_60 = arith.constant 0 : index
    %c0_61 = arith.constant 0 : index
    %166 = vector.load %arg9[%c0_59, %c0_60, %c0_61] : memref<2x32x64xf32, #tpu.memory_space<vmem>>, vector<1x32x64xf32>
    %167 = vector.shape_cast %166 : vector<1x32x64xf32> to vector<32x64xf32>
    %cst_62 = arith.constant dense<0.000000e+00> : vector<16x64xf32>
    %168 = tpu.matmul %165, %167, %cst_62 {dimension_numbers = #tpu.dot_dimension_numbers<[1], [0], [0], [1], [0, 0, 1, 1], [], []>} : vector<16x32xf32>, vector<32x64xf32>, vector<16x64xf32> -> vector<16x64xf32>
    %cst_63 = arith.constant 0.000000e+00 : f32
    %169 = vector.broadcast %cst_63 : f32 to vector<16x64xf32>
    %170 = arith.maximumf %168, %169 : vector<16x64xf32>
    %c0_64 = arith.constant 0 : index
    %c0_65 = arith.constant 0 : index
    %c0_66 = arith.constant 0 : index
    %171 = vector.load %arg10[%c0_64, %c0_65, %c0_66] : memref<2x64x32xf32, #tpu.memory_space<vmem>>, vector<1x64x32xf32>
    %172 = vector.shape_cast %171 : vector<1x64x32xf32> to vector<64x32xf32>
    %cst_67 = arith.constant dense<0.000000e+00> : vector<16x32xf32>
    %173 = tpu.matmul %170, %172, %cst_67 {dimension_numbers = #tpu.dot_dimension_numbers<[1], [0], [0], [1], [0, 0, 1, 1], [], []>} : vector<16x64xf32>, vector<64x32xf32>, vector<16x32xf32> -> vector<16x32xf32>
    %174 = arith.addf %143, %173 : vector<16x32xf32>
    %c1 = arith.constant 1 : index
    %c0_68 = arith.constant 0 : index
    %c0_69 = arith.constant 0 : index
    %175 = vector.load %arg5[%c1, %c0_68, %c0_69] : memref<2x1x32xf32, #tpu.memory_space<vmem>>, vector<1x1x32xf32>
    %176 = vector.shape_cast %175 : vector<1x1x32xf32> to vector<1x32xf32>
    %cst_70 = arith.constant dense<0.000000e+00> : vector<16xf32>
    %177 = vector.multi_reduction <add>, %174, %cst_70 [1] : vector<16x32xf32> to vector<16xf32>
    %178 = vector.shape_cast %177 : vector<16xf32> to vector<16x1xf32>
    %cst_71 = arith.constant 3.200000e+01 : f32
    %179 = vector.broadcast %cst_71 : f32 to vector<16x1xf32>
    %180 = arith.divf %178, %179 : vector<16x1xf32>
    %181 = vector.broadcast %180 : vector<16x1xf32> to vector<16x32xf32>
    %182 = arith.subf %174, %181 : vector<16x32xf32>
    %183 = arith.mulf %182, %182 : vector<16x32xf32>
    %cst_72 = arith.constant dense<0.000000e+00> : vector<16xf32>
    %184 = vector.multi_reduction <add>, %183, %cst_72 [1] : vector<16x32xf32> to vector<16xf32>
    %185 = vector.shape_cast %184 : vector<16xf32> to vector<16x1xf32>
    %cst_73 = arith.constant 3.200000e+01 : f32
    %186 = vector.broadcast %cst_73 : f32 to vector<16x1xf32>
    %187 = arith.divf %185, %186 : vector<16x1xf32>
    %188 = vector.broadcast %180 : vector<16x1xf32> to vector<16x32xf32>
    %189 = arith.subf %174, %188 : vector<16x32xf32>
    %cst_74 = arith.constant 9.99999974E-6 : f32
    %190 = vector.broadcast %cst_74 : f32 to vector<16x1xf32>
    %191 = arith.addf %187, %190 : vector<16x1xf32>
    %192 = math.rsqrt %191 : vector<16x1xf32>
    %193 = vector.broadcast %192 : vector<16x1xf32> to vector<16x32xf32>
    %194 = arith.mulf %189, %193 : vector<16x32xf32>
    %195 = vector.broadcast %176 : vector<1x32xf32> to vector<16x32xf32>
    %196 = arith.mulf %194, %195 : vector<16x32xf32>
    %c1_75 = arith.constant 1 : index
    %c0_76 = arith.constant 0 : index
    %c0_77 = arith.constant 0 : index
    %197 = vector.load %arg6[%c1_75, %c0_76, %c0_77] : memref<2x32x96xf32, #tpu.memory_space<vmem>>, vector<1x32x96xf32>
    %198 = vector.shape_cast %197 : vector<1x32x96xf32> to vector<32x96xf32>
    %cst_78 = arith.constant dense<0.000000e+00> : vector<16x96xf32>
    %199 = tpu.matmul %196, %198, %cst_78 {dimension_numbers = #tpu.dot_dimension_numbers<[1], [0], [0], [1], [0, 0, 1, 1], [], []>} : vector<16x32xf32>, vector<32x96xf32>, vector<16x96xf32> -> vector<16x96xf32>
    %c1_79 = arith.constant 1 : index
    %c0_80 = arith.constant 0 : index
    %c0_81 = arith.constant 0 : index
    %200 = vector.load %arg7[%c1_79, %c0_80, %c0_81] : memref<2x32x32xf32, #tpu.memory_space<vmem>>, vector<1x32x32xf32>
    %201 = vector.shape_cast %200 : vector<1x32x32xf32> to vector<32x32xf32>
    %cst_82 = arith.constant 0.000000e+00 : f32
    %202 = vector.broadcast %cst_82 : f32 to vector<16x32xf32>
    %203 = vector.extract_strided_slice %199 {offsets = [0, 0], sizes = [16, 8], strides = [1, 1]} : vector<16x96xf32> to vector<16x8xf32>
    %204 = vector.shape_cast %203 : vector<16x8xf32> to vector<2x8x8xf32>
    %205 = vector.extract_strided_slice %199 {offsets = [0, 32], sizes = [16, 8], strides = [1, 1]} : vector<16x96xf32> to vector<16x8xf32>
    %206 = vector.shape_cast %205 : vector<16x8xf32> to vector<2x8x8xf32>
    %207 = vector.extract_strided_slice %199 {offsets = [0, 64], sizes = [16, 8], strides = [1, 1]} : vector<16x96xf32> to vector<16x8xf32>
    %208 = vector.shape_cast %207 : vector<16x8xf32> to vector<2x8x8xf32>
    "tpu.trace_start"() <{level = 10 : i32, message = "bqd,bkd->bqk"}> : () -> ()
    %cst_83 = arith.constant dense<0.000000e+00> : vector<2x8x8xf32>
    %209 = tpu.matmul %204, %206, %cst_83 {dimension_numbers = #tpu.dot_dimension_numbers<[2], [2], [1], [1], [0, 0, 0, 1, 1, 1], [0], [0]>} : vector<2x8x8xf32>, vector<2x8x8xf32>, vector<2x8x8xf32> -> vector<2x8x8xf32>
    "tpu.trace_stop"() : () -> ()
    %cst_84 = arith.constant 0.353553385 : f32
    %210 = vector.broadcast %cst_84 : f32 to vector<2x8x8xf32>
    %211 = arith.mulf %209, %210 : vector<2x8x8xf32>
    %212 = vector.shape_cast %10 : vector<2x8xf32> to vector<2x1x8xf32>
    %213 = vector.broadcast %212 : vector<2x1x8xf32> to vector<2x8x8xf32>
    %214 = arith.addf %211, %213 : vector<2x8x8xf32>
    %cst_85 = arith.constant dense<0xFF800000> : vector<2x8xf32>
    %215 = vector.multi_reduction <maximumf>, %214, %cst_85 [2] : vector<2x8x8xf32> to vector<2x8xf32>
    %216 = vector.shape_cast %215 : vector<2x8xf32> to vector<2x8x1xf32>
    %217 = vector.broadcast %216 : vector<2x8x1xf32> to vector<2x8x8xf32>
    %218 = arith.subf %214, %217 : vector<2x8x8xf32>
    %219 = math.exp %218 : vector<2x8x8xf32>
    %cst_86 = arith.constant dense<0.000000e+00> : vector<2x8xf32>
    %220 = vector.multi_reduction <add>, %219, %cst_86 [2] : vector<2x8x8xf32> to vector<2x8xf32>
    %221 = vector.shape_cast %220 : vector<2x8xf32> to vector<2x8x1xf32>
    %222 = vector.broadcast %221 : vector<2x8x1xf32> to vector<2x8x8xf32>
    %223 = arith.divf %219, %222 : vector<2x8x8xf32>
    "tpu.trace_start"() <{level = 10 : i32, message = "bqk,bkd->bqd"}> : () -> ()
    %cst_87 = arith.constant dense<0.000000e+00> : vector<2x8x8xf32>
    %224 = tpu.matmul %223, %208, %cst_87 {dimension_numbers = #tpu.dot_dimension_numbers<[2], [1], [1], [2], [0, 0, 0, 1, 1, 2], [0], [0]>} : vector<2x8x8xf32>, vector<2x8x8xf32>, vector<2x8x8xf32> -> vector<2x8x8xf32>
    "tpu.trace_stop"() : () -> ()
    %225 = vector.shape_cast %224 : vector<2x8x8xf32> to vector<16x8xf32>
    %226 = vector.extract_strided_slice %201 {offsets = [0, 0], sizes = [8, 32], strides = [1, 1]} : vector<32x32xf32> to vector<8x32xf32>
    %cst_88 = arith.constant dense<0.000000e+00> : vector<16x32xf32>
    %227 = tpu.matmul %225, %226, %cst_88 {dimension_numbers = #tpu.dot_dimension_numbers<[1], [0], [0], [1], [0, 0, 1, 1], [], []>} : vector<16x8xf32>, vector<8x32xf32>, vector<16x32xf32> -> vector<16x32xf32>
    %228 = arith.addf %202, %227 : vector<16x32xf32>
    %229 = vector.extract_strided_slice %199 {offsets = [0, 8], sizes = [16, 8], strides = [1, 1]} : vector<16x96xf32> to vector<16x8xf32>
    %230 = vector.shape_cast %229 : vector<16x8xf32> to vector<2x8x8xf32>
    %231 = vector.extract_strided_slice %199 {offsets = [0, 40], sizes = [16, 8], strides = [1, 1]} : vector<16x96xf32> to vector<16x8xf32>
    %232 = vector.shape_cast %231 : vector<16x8xf32> to vector<2x8x8xf32>
    %233 = vector.extract_strided_slice %199 {offsets = [0, 72], sizes = [16, 8], strides = [1, 1]} : vector<16x96xf32> to vector<16x8xf32>
    %234 = vector.shape_cast %233 : vector<16x8xf32> to vector<2x8x8xf32>
    "tpu.trace_start"() <{level = 10 : i32, message = "bqd,bkd->bqk"}> : () -> ()
    %cst_89 = arith.constant dense<0.000000e+00> : vector<2x8x8xf32>
    %235 = tpu.matmul %230, %232, %cst_89 {dimension_numbers = #tpu.dot_dimension_numbers<[2], [2], [1], [1], [0, 0, 0, 1, 1, 1], [0], [0]>} : vector<2x8x8xf32>, vector<2x8x8xf32>, vector<2x8x8xf32> -> vector<2x8x8xf32>
    "tpu.trace_stop"() : () -> ()
    %cst_90 = arith.constant 0.353553385 : f32
    %236 = vector.broadcast %cst_90 : f32 to vector<2x8x8xf32>
    %237 = arith.mulf %235, %236 : vector<2x8x8xf32>
    %238 = vector.shape_cast %10 : vector<2x8xf32> to vector<2x1x8xf32>
    %239 = vector.broadcast %238 : vector<2x1x8xf32> to vector<2x8x8xf32>
    %240 = arith.addf %237, %239 : vector<2x8x8xf32>
    %cst_91 = arith.constant dense<0xFF800000> : vector<2x8xf32>
    %241 = vector.multi_reduction <maximumf>, %240, %cst_91 [2] : vector<2x8x8xf32> to vector<2x8xf32>
    %242 = vector.shape_cast %241 : vector<2x8xf32> to vector<2x8x1xf32>
    %243 = vector.broadcast %242 : vector<2x8x1xf32> to vector<2x8x8xf32>
    %244 = arith.subf %240, %243 : vector<2x8x8xf32>
    %245 = math.exp %244 : vector<2x8x8xf32>
    %cst_92 = arith.constant dense<0.000000e+00> : vector<2x8xf32>
    %246 = vector.multi_reduction <add>, %245, %cst_92 [2] : vector<2x8x8xf32> to vector<2x8xf32>
    %247 = vector.shape_cast %246 : vector<2x8xf32> to vector<2x8x1xf32>
    %248 = vector.broadcast %247 : vector<2x8x1xf32> to vector<2x8x8xf32>
    %249 = arith.divf %245, %248 : vector<2x8x8xf32>
    "tpu.trace_start"() <{level = 10 : i32, message = "bqk,bkd->bqd"}> : () -> ()
    %cst_93 = arith.constant dense<0.000000e+00> : vector<2x8x8xf32>
    %250 = tpu.matmul %249, %234, %cst_93 {dimension_numbers = #tpu.dot_dimension_numbers<[2], [1], [1], [2], [0, 0, 0, 1, 1, 2], [0], [0]>} : vector<2x8x8xf32>, vector<2x8x8xf32>, vector<2x8x8xf32> -> vector<2x8x8xf32>
    "tpu.trace_stop"() : () -> ()
    %251 = vector.shape_cast %250 : vector<2x8x8xf32> to vector<16x8xf32>
    %252 = vector.extract_strided_slice %201 {offsets = [8, 0], sizes = [8, 32], strides = [1, 1]} : vector<32x32xf32> to vector<8x32xf32>
    %cst_94 = arith.constant dense<0.000000e+00> : vector<16x32xf32>
    %253 = tpu.matmul %251, %252, %cst_94 {dimension_numbers = #tpu.dot_dimension_numbers<[1], [0], [0], [1], [0, 0, 1, 1], [], []>} : vector<16x8xf32>, vector<8x32xf32>, vector<16x32xf32> -> vector<16x32xf32>
    %254 = arith.addf %228, %253 : vector<16x32xf32>
    %255 = vector.extract_strided_slice %199 {offsets = [0, 16], sizes = [16, 8], strides = [1, 1]} : vector<16x96xf32> to vector<16x8xf32>
    %256 = vector.shape_cast %255 : vector<16x8xf32> to vector<2x8x8xf32>
    %257 = vector.extract_strided_slice %199 {offsets = [0, 48], sizes = [16, 8], strides = [1, 1]} : vector<16x96xf32> to vector<16x8xf32>
    %258 = vector.shape_cast %257 : vector<16x8xf32> to vector<2x8x8xf32>
    %259 = vector.extract_strided_slice %199 {offsets = [0, 80], sizes = [16, 8], strides = [1, 1]} : vector<16x96xf32> to vector<16x8xf32>
    %260 = vector.shape_cast %259 : vector<16x8xf32> to vector<2x8x8xf32>
    "tpu.trace_start"() <{level = 10 : i32, message = "bqd,bkd->bqk"}> : () -> ()
    %cst_95 = arith.constant dense<0.000000e+00> : vector<2x8x8xf32>
    %261 = tpu.matmul %256, %258, %cst_95 {dimension_numbers = #tpu.dot_dimension_numbers<[2], [2], [1], [1], [0, 0, 0, 1, 1, 1], [0], [0]>} : vector<2x8x8xf32>, vector<2x8x8xf32>, vector<2x8x8xf32> -> vector<2x8x8xf32>
    "tpu.trace_stop"() : () -> ()
    %cst_96 = arith.constant 0.353553385 : f32
    %262 = vector.broadcast %cst_96 : f32 to vector<2x8x8xf32>
    %263 = arith.mulf %261, %262 : vector<2x8x8xf32>
    %264 = vector.shape_cast %10 : vector<2x8xf32> to vector<2x1x8xf32>
    %265 = vector.broadcast %264 : vector<2x1x8xf32> to vector<2x8x8xf32>
    %266 = arith.addf %263, %265 : vector<2x8x8xf32>
    %cst_97 = arith.constant dense<0xFF800000> : vector<2x8xf32>
    %267 = vector.multi_reduction <maximumf>, %266, %cst_97 [2] : vector<2x8x8xf32> to vector<2x8xf32>
    %268 = vector.shape_cast %267 : vector<2x8xf32> to vector<2x8x1xf32>
    %269 = vector.broadcast %268 : vector<2x8x1xf32> to vector<2x8x8xf32>
    %270 = arith.subf %266, %269 : vector<2x8x8xf32>
    %271 = math.exp %270 : vector<2x8x8xf32>
    %cst_98 = arith.constant dense<0.000000e+00> : vector<2x8xf32>
    %272 = vector.multi_reduction <add>, %271, %cst_98 [2] : vector<2x8x8xf32> to vector<2x8xf32>
    %273 = vector.shape_cast %272 : vector<2x8xf32> to vector<2x8x1xf32>
    %274 = vector.broadcast %273 : vector<2x8x1xf32> to vector<2x8x8xf32>
    %275 = arith.divf %271, %274 : vector<2x8x8xf32>
    "tpu.trace_start"() <{level = 10 : i32, message = "bqk,bkd->bqd"}> : () -> ()
    %cst_99 = arith.constant dense<0.000000e+00> : vector<2x8x8xf32>
    %276 = tpu.matmul %275, %260, %cst_99 {dimension_numbers = #tpu.dot_dimension_numbers<[2], [1], [1], [2], [0, 0, 0, 1, 1, 2], [0], [0]>} : vector<2x8x8xf32>, vector<2x8x8xf32>, vector<2x8x8xf32> -> vector<2x8x8xf32>
    "tpu.trace_stop"() : () -> ()
    %277 = vector.shape_cast %276 : vector<2x8x8xf32> to vector<16x8xf32>
    %278 = vector.extract_strided_slice %201 {offsets = [16, 0], sizes = [8, 32], strides = [1, 1]} : vector<32x32xf32> to vector<8x32xf32>
    %cst_100 = arith.constant dense<0.000000e+00> : vector<16x32xf32>
    %279 = tpu.matmul %277, %278, %cst_100 {dimension_numbers = #tpu.dot_dimension_numbers<[1], [0], [0], [1], [0, 0, 1, 1], [], []>} : vector<16x8xf32>, vector<8x32xf32>, vector<16x32xf32> -> vector<16x32xf32>
    %280 = arith.addf %254, %279 : vector<16x32xf32>
    %281 = vector.extract_strided_slice %199 {offsets = [0, 24], sizes = [16, 8], strides = [1, 1]} : vector<16x96xf32> to vector<16x8xf32>
    %282 = vector.shape_cast %281 : vector<16x8xf32> to vector<2x8x8xf32>
    %283 = vector.extract_strided_slice %199 {offsets = [0, 56], sizes = [16, 8], strides = [1, 1]} : vector<16x96xf32> to vector<16x8xf32>
    %284 = vector.shape_cast %283 : vector<16x8xf32> to vector<2x8x8xf32>
    %285 = vector.extract_strided_slice %199 {offsets = [0, 88], sizes = [16, 8], strides = [1, 1]} : vector<16x96xf32> to vector<16x8xf32>
    %286 = vector.shape_cast %285 : vector<16x8xf32> to vector<2x8x8xf32>
    "tpu.trace_start"() <{level = 10 : i32, message = "bqd,bkd->bqk"}> : () -> ()
    %cst_101 = arith.constant dense<0.000000e+00> : vector<2x8x8xf32>
    %287 = tpu.matmul %282, %284, %cst_101 {dimension_numbers = #tpu.dot_dimension_numbers<[2], [2], [1], [1], [0, 0, 0, 1, 1, 1], [0], [0]>} : vector<2x8x8xf32>, vector<2x8x8xf32>, vector<2x8x8xf32> -> vector<2x8x8xf32>
    "tpu.trace_stop"() : () -> ()
    %cst_102 = arith.constant 0.353553385 : f32
    %288 = vector.broadcast %cst_102 : f32 to vector<2x8x8xf32>
    %289 = arith.mulf %287, %288 : vector<2x8x8xf32>
    %290 = vector.shape_cast %10 : vector<2x8xf32> to vector<2x1x8xf32>
    %291 = vector.broadcast %290 : vector<2x1x8xf32> to vector<2x8x8xf32>
    %292 = arith.addf %289, %291 : vector<2x8x8xf32>
    %cst_103 = arith.constant dense<0xFF800000> : vector<2x8xf32>
    %293 = vector.multi_reduction <maximumf>, %292, %cst_103 [2] : vector<2x8x8xf32> to vector<2x8xf32>
    %294 = vector.shape_cast %293 : vector<2x8xf32> to vector<2x8x1xf32>
    %295 = vector.broadcast %294 : vector<2x8x1xf32> to vector<2x8x8xf32>
    %296 = arith.subf %292, %295 : vector<2x8x8xf32>
    %297 = math.exp %296 : vector<2x8x8xf32>
    %cst_104 = arith.constant dense<0.000000e+00> : vector<2x8xf32>
    %298 = vector.multi_reduction <add>, %297, %cst_104 [2] : vector<2x8x8xf32> to vector<2x8xf32>
    %299 = vector.shape_cast %298 : vector<2x8xf32> to vector<2x8x1xf32>
    %300 = vector.broadcast %299 : vector<2x8x1xf32> to vector<2x8x8xf32>
    %301 = arith.divf %297, %300 : vector<2x8x8xf32>
    "tpu.trace_start"() <{level = 10 : i32, message = "bqk,bkd->bqd"}> : () -> ()
    %cst_105 = arith.constant dense<0.000000e+00> : vector<2x8x8xf32>
    %302 = tpu.matmul %301, %286, %cst_105 {dimension_numbers = #tpu.dot_dimension_numbers<[2], [1], [1], [2], [0, 0, 0, 1, 1, 2], [0], [0]>} : vector<2x8x8xf32>, vector<2x8x8xf32>, vector<2x8x8xf32> -> vector<2x8x8xf32>
    "tpu.trace_stop"() : () -> ()
    %303 = vector.shape_cast %302 : vector<2x8x8xf32> to vector<16x8xf32>
    %304 = vector.extract_strided_slice %201 {offsets = [24, 0], sizes = [8, 32], strides = [1, 1]} : vector<32x32xf32> to vector<8x32xf32>
    %cst_106 = arith.constant dense<0.000000e+00> : vector<16x32xf32>
    %305 = tpu.matmul %303, %304, %cst_106 {dimension_numbers = #tpu.dot_dimension_numbers<[1], [0], [0], [1], [0, 0, 1, 1], [], []>} : vector<16x8xf32>, vector<8x32xf32>, vector<16x32xf32> -> vector<16x32xf32>
    %306 = arith.addf %280, %305 : vector<16x32xf32>
    %307 = arith.addf %174, %306 : vector<16x32xf32>
    %c1_107 = arith.constant 1 : index
    %c0_108 = arith.constant 0 : index
    %c0_109 = arith.constant 0 : index
    %308 = vector.load %arg8[%c1_107, %c0_108, %c0_109] : memref<2x1x32xf32, #tpu.memory_space<vmem>>, vector<1x1x32xf32>
    %309 = vector.shape_cast %308 : vector<1x1x32xf32> to vector<1x32xf32>
    %cst_110 = arith.constant dense<0.000000e+00> : vector<16xf32>
    %310 = vector.multi_reduction <add>, %307, %cst_110 [1] : vector<16x32xf32> to vector<16xf32>
    %311 = vector.shape_cast %310 : vector<16xf32> to vector<16x1xf32>
    %cst_111 = arith.constant 3.200000e+01 : f32
    %312 = vector.broadcast %cst_111 : f32 to vector<16x1xf32>
    %313 = arith.divf %311, %312 : vector<16x1xf32>
    %314 = vector.broadcast %313 : vector<16x1xf32> to vector<16x32xf32>
    %315 = arith.subf %307, %314 : vector<16x32xf32>
    %316 = arith.mulf %315, %315 : vector<16x32xf32>
    %cst_112 = arith.constant dense<0.000000e+00> : vector<16xf32>
    %317 = vector.multi_reduction <add>, %316, %cst_112 [1] : vector<16x32xf32> to vector<16xf32>
    %318 = vector.shape_cast %317 : vector<16xf32> to vector<16x1xf32>
    %cst_113 = arith.constant 3.200000e+01 : f32
    %319 = vector.broadcast %cst_113 : f32 to vector<16x1xf32>
    %320 = arith.divf %318, %319 : vector<16x1xf32>
    %321 = vector.broadcast %313 : vector<16x1xf32> to vector<16x32xf32>
    %322 = arith.subf %307, %321 : vector<16x32xf32>
    %cst_114 = arith.constant 9.99999974E-6 : f32
    %323 = vector.broadcast %cst_114 : f32 to vector<16x1xf32>
    %324 = arith.addf %320, %323 : vector<16x1xf32>
    %325 = math.rsqrt %324 : vector<16x1xf32>
    %326 = vector.broadcast %325 : vector<16x1xf32> to vector<16x32xf32>
    %327 = arith.mulf %322, %326 : vector<16x32xf32>
    %328 = vector.broadcast %309 : vector<1x32xf32> to vector<16x32xf32>
    %329 = arith.mulf %327, %328 : vector<16x32xf32>
    %c1_115 = arith.constant 1 : index
    %c0_116 = arith.constant 0 : index
    %c0_117 = arith.constant 0 : index
    %330 = vector.load %arg9[%c1_115, %c0_116, %c0_117] : memref<2x32x64xf32, #tpu.memory_space<vmem>>, vector<1x32x64xf32>
    %331 = vector.shape_cast %330 : vector<1x32x64xf32> to vector<32x64xf32>
    %cst_118 = arith.constant dense<0.000000e+00> : vector<16x64xf32>
    %332 = tpu.matmul %329, %331, %cst_118 {dimension_numbers = #tpu.dot_dimension_numbers<[1], [0], [0], [1], [0, 0, 1, 1], [], []>} : vector<16x32xf32>, vector<32x64xf32>, vector<16x64xf32> -> vector<16x64xf32>
    %cst_119 = arith.constant 0.000000e+00 : f32
    %333 = vector.broadcast %cst_119 : f32 to vector<16x64xf32>
    %334 = arith.maximumf %332, %333 : vector<16x64xf32>
    %c1_120 = arith.constant 1 : index
    %c0_121 = arith.constant 0 : index
    %c0_122 = arith.constant 0 : index
    %335 = vector.load %arg10[%c1_120, %c0_121, %c0_122] : memref<2x64x32xf32, #tpu.memory_space<vmem>>, vector<1x64x32xf32>
    %336 = vector.shape_cast %335 : vector<1x64x32xf32> to vector<64x32xf32>
    %cst_123 = arith.constant dense<0.000000e+00> : vector<16x32xf32>
    %337 = tpu.matmul %334, %336, %cst_123 {dimension_numbers = #tpu.dot_dimension_numbers<[1], [0], [0], [1], [0, 0, 1, 1], [], []>} : vector<16x64xf32>, vector<64x32xf32>, vector<16x32xf32> -> vector<16x32xf32>
    %338 = arith.addf %307, %337 : vector<16x32xf32>
    %c0_124 = arith.constant 0 : index
    %c0_125 = arith.constant 0 : index
    %339 = vector.load %arg11[%c0_124, %c0_125] : memref<1x32xf32, #tpu.memory_space<vmem>>, vector<1x32xf32>
    %c0_126 = arith.constant 0 : index
    %c0_127 = arith.constant 0 : index
    %340 = vector.load %arg12[%c0_126, %c0_127] : memref<1x32xf32, #tpu.memory_space<vmem>>, vector<1x32xf32>
    %cst_128 = arith.constant dense<0.000000e+00> : vector<16xf32>
    %341 = vector.multi_reduction <add>, %338, %cst_128 [1] : vector<16x32xf32> to vector<16xf32>
    %342 = vector.shape_cast %341 : vector<16xf32> to vector<16x1xf32>
    %cst_129 = arith.constant 3.200000e+01 : f32
    %343 = vector.broadcast %cst_129 : f32 to vector<16x1xf32>
    %344 = arith.divf %342, %343 : vector<16x1xf32>
    %345 = vector.broadcast %344 : vector<16x1xf32> to vector<16x32xf32>
    %346 = arith.subf %338, %345 : vector<16x32xf32>
    %347 = arith.mulf %346, %346 : vector<16x32xf32>
    %cst_130 = arith.constant dense<0.000000e+00> : vector<16xf32>
    %348 = vector.multi_reduction <add>, %347, %cst_130 [1] : vector<16x32xf32> to vector<16xf32>
    %349 = vector.shape_cast %348 : vector<16xf32> to vector<16x1xf32>
    %cst_131 = arith.constant 3.200000e+01 : f32
    %350 = vector.broadcast %cst_131 : f32 to vector<16x1xf32>
    %351 = arith.divf %349, %350 : vector<16x1xf32>
    %352 = vector.broadcast %344 : vector<16x1xf32> to vector<16x32xf32>
    %353 = arith.subf %338, %352 : vector<16x32xf32>
    %cst_132 = arith.constant 9.99999974E-6 : f32
    %354 = vector.broadcast %cst_132 : f32 to vector<16x1xf32>
    %355 = arith.addf %351, %354 : vector<16x1xf32>
    %356 = math.rsqrt %355 : vector<16x1xf32>
    %357 = vector.broadcast %356 : vector<16x1xf32> to vector<16x32xf32>
    %358 = arith.mulf %353, %357 : vector<16x32xf32>
    %359 = vector.broadcast %339 : vector<1x32xf32> to vector<16x32xf32>
    %360 = arith.mulf %358, %359 : vector<16x32xf32>
    %361 = vector.broadcast %340 : vector<1x32xf32> to vector<16x32xf32>
    %362 = arith.addf %360, %361 : vector<16x32xf32>
    %363 = vector.shape_cast %362 : vector<16x32xf32> to vector<2x8x32xf32>
    %cst_133 = arith.constant dense<0.000000e+00> : vector<2x32xf32>
    %364 = vector.multi_reduction <add>, %363, %cst_133 [1] : vector<2x8x32xf32> to vector<2x32xf32>
    %cst_134 = arith.constant 8.000000e+00 : f32
    %365 = vector.broadcast %cst_134 : f32 to vector<2x32xf32>
    %366 = arith.divf %364, %365 : vector<2x32xf32>
    %c0_135 = arith.constant 0 : index
    %c0_136 = arith.constant 0 : index
    %367 = vector.load %arg13[%c0_135, %c0_136] : memref<1x32xf32, #tpu.memory_space<vmem>>, vector<1x32xf32>
    %c0_137 = arith.constant 0 : index
    %c0_138 = arith.constant 0 : index
    %368 = vector.load %arg14[%c0_137, %c0_138] : memref<1x32xf32, #tpu.memory_space<vmem>>, vector<1x32xf32>
    %cst_139 = arith.constant dense<0.000000e+00> : vector<2xf32>
    %369 = vector.multi_reduction <add>, %366, %cst_139 [1] : vector<2x32xf32> to vector<2xf32>
    %370 = vector.shape_cast %369 : vector<2xf32> to vector<2x1xf32>
    %cst_140 = arith.constant 3.200000e+01 : f32
    %371 = vector.broadcast %cst_140 : f32 to vector<2x1xf32>
    %372 = arith.divf %370, %371 : vector<2x1xf32>
    %373 = vector.broadcast %372 : vector<2x1xf32> to vector<2x32xf32>
    %374 = arith.subf %366, %373 : vector<2x32xf32>
    %375 = arith.mulf %374, %374 : vector<2x32xf32>
    %cst_141 = arith.constant dense<0.000000e+00> : vector<2xf32>
    %376 = vector.multi_reduction <add>, %375, %cst_141 [1] : vector<2x32xf32> to vector<2xf32>
    %377 = vector.shape_cast %376 : vector<2xf32> to vector<2x1xf32>
    %cst_142 = arith.constant 3.200000e+01 : f32
    %378 = vector.broadcast %cst_142 : f32 to vector<2x1xf32>
    %379 = arith.divf %377, %378 : vector<2x1xf32>
    %380 = vector.broadcast %372 : vector<2x1xf32> to vector<2x32xf32>
    %381 = arith.subf %366, %380 : vector<2x32xf32>
    %cst_143 = arith.constant 9.99999974E-6 : f32
    %382 = vector.broadcast %cst_143 : f32 to vector<2x1xf32>
    %383 = arith.addf %379, %382 : vector<2x1xf32>
    %384 = math.rsqrt %383 : vector<2x1xf32>
    %385 = vector.broadcast %384 : vector<2x1xf32> to vector<2x32xf32>
    %386 = arith.mulf %381, %385 : vector<2x32xf32>
    %387 = vector.broadcast %367 : vector<1x32xf32> to vector<2x32xf32>
    %388 = arith.mulf %386, %387 : vector<2x32xf32>
    %389 = vector.broadcast %368 : vector<1x32xf32> to vector<2x32xf32>
    %390 = arith.addf %388, %389 : vector<2x32xf32>
    %c0_144 = arith.constant 0 : index
    %c0_145 = arith.constant 0 : index
    %391 = vector.load %arg15[%c0_144, %c0_145] : memref<32x4xf32, #tpu.memory_space<vmem>>, vector<32x4xf32>
    %cst_146 = arith.constant dense<0.000000e+00> : vector<2x4xf32>
    %392 = tpu.matmul %390, %391, %cst_146 {dimension_numbers = #tpu.dot_dimension_numbers<[1], [0], [0], [1], [0, 0, 1, 1], [], []>} : vector<2x32xf32>, vector<32x4xf32>, vector<2x4xf32> -> vector<2x4xf32>
    %c0_147 = arith.constant 0 : index
    %c0_148 = arith.constant 0 : index
    %393 = vector.load %arg16[%c0_147, %c0_148] : memref<1x4xf32, #tpu.memory_space<vmem>>, vector<1x4xf32>
    %394 = vector.broadcast %393 : vector<1x4xf32> to vector<2x4xf32>
    %395 = arith.addf %392, %394 : vector<2x4xf32>
    %c0_149 = arith.constant 0 : index
    %c0_150 = arith.constant 0 : index
    %396 = vector.load %arg17[%c0_149, %c0_150] : memref<2x4xf32, #tpu.memory_space<vmem>>, vector<2x4xf32>
    tpu.vector_store %arg17[%c0_149, %c0_150], %395 {strides = array<i32>} : memref<2x4xf32, #tpu.memory_space<vmem>>, vector<2x4xf32>,
    return
  }
}

</mosaic_0001>

<bundles_post_ra>
// kernel: forward.1
= control target key start
LH: loop header
LB: loop body
LE: loop exit
PB: predicated region body
PF: predicated region fallthrough
CT: control target
= control target key end

     0   :  { %s3096_s0 = inlined_call_operand.vmem [shape: f32[2,8,32], index: 0, kind: input, shape index: {}]   ;;  %s3097_s1 = inlined_call_operand.vmem [shape: f32[2,8,32], index: 1, kind: input, shape index: {}]   ;;  %s3098_s2 = inlined_call_operand.vmem [shape: f32[2,8,32], index: 2, kind: input, shape index: {}]   ;;  %s3099_s3 = inlined_call_operand.vmem [shape: f32[8,32], index: 3, kind: input, shape index: {}]   ;;  %s3100_s4 = inlined_call_operand.vmem [shape: f32[2,8], index: 4, kind: input, shape index: {}]   ;;  %s3101_s5 = inlined_call_operand.vmem [shape: f32[2,1,32], index: 5, kind: input, shape index: {}]   ;;  %s3102_s6 = inlined_call_operand.vmem [shape: f32[2,32,96], index: 6, kind: input, shape index: {}]   ;;  %s3103_s7 = inlined_call_operand.vmem [shape: f32[2,32,32], index: 7, kind: input, shape index: {}]   ;;  %s3104_s8 = inlined_call_operand.vmem [shape: f32[2,1,32], index: 8, kind: input, shape index: {}]   ;;  %s3105_s9 = inlined_call_operand.vmem [shape: f32[2,32,64], index: 9, kind: input, shape index: {}]   ;;  %s3106_s10 = inlined_call_operand.vmem [shape: f32[2,64,32], index: 10, kind: input, shape index: {}]   ;;  %s3107_s11 = inlined_call_operand.vmem [shape: f32[1,32], index: 11, kind: input, shape index: {}]   ;;  %s3108_s12 = inlined_call_operand.vmem [shape: f32[1,32], index: 12, kind: input, shape index: {}]   ;;  %s3109_s13 = inlined_call_operand.vmem [shape: f32[1,32], index: 13, kind: input, shape index: {}]   ;;  %s3110_s14 = inlined_call_operand.vmem [shape: f32[1,32], index: 14, kind: input, shape index: {}]   ;;  %s3111_s15 = inlined_call_operand.vmem [shape: f32[32,4], index: 15, kind: input, shape index: {}]   ;;  %s3112_s16 = inlined_call_operand.vmem [shape: f32[1,4], index: 16, kind: input, shape index: {}]   ;;  %s3113_s17 = inlined_call_operand.hbm [shape: f32[2,4], index: 17, kind: output, shape index: {}]  }
   0x1   :  { %3120 = sst [smem:[#allocation5_spill]] %s3096_s0 }
   0x2   :  { %3121 = sst [smem:[#allocation6_spill]] %s3097_s1 }
   0x3   :  { %3122 = sst [smem:[#allocation7_spill]] %s3108_s12 }
   0x4   :  { %s3123_s26 = sld [smem:[#allocation5_spill]]  ;;  %v63_v2 = vld [vmem:[%s3098_s2] sm:$0xff]  ;;  %vm72_vm0 = vcmask 261120   ;;  %v64_v8 = vld [vmem:[%s3098_s2 + $0x8] sm:$0xff] }
   0x5   :  { %s3124_s12 = sld [smem:[#allocation6_spill]]  ;;  %v67_v4 = vld [vmem:[%s3099_s3] sm:$0xff] }
   0xa   :  { %v57_v0 = vld [vmem:[%s3123_s26] sm:$0xff]  ;;  %v58_v5 = vld [vmem:[%s3123_s26 + $0x8] sm:$0xff] }
   0xb   :  { %v59_v1 = vld [vmem:[%s3124_s12] sm:$0xff]  ;;  %v60_v6 = vld [vmem:[%s3124_s12 + $0x8] sm:$0xff] }
   0xc   :  { %v61_v3 = vadd.f32 %v59_v1, %v57_v0  ;;  %v62_v7 = vadd.f32 %v60_v6, %v58_v5 }
   0xe   :  { %v65_v9 = vadd.f32 %v63_v2, %v61_v3  ;;  %v66_v11 = vadd.f32 %v64_v8, %v62_v7 }
  0x10   :  { %v2585_v10 = vadd.f32 %v67_v4, %v65_v9 }
  0x11   :  { %22 = vsyncpa [#allocation3], 0  ;;  %v2589_v13 = vadd.f32 %v67_v4, %v66_v11  ;;  %v2460_v15 = vmov 32.0   ;;  %v132_v32 = vld [vmem:[%s3102_s6 + $0x18] sm:$0xff]  ;;  %v131_v33 = vld [vmem:[%s3102_s6 + $0x10] sm:$0xff]  ;;  %s2461_s30 = smov 88  }
  0x12   :  { %v73_v12 = vsel %vm72_vm0, %v2585_v10, 0.0  ;;  %2344 = vrcp.f32 %v2460_v15  ;;  %151 = vmatpush.msra.mxu0 %v132_v32  ;;  %v130_v34 = vld [vmem:[%s3102_s6 + $0x8] sm:$0xff]  ;;  %v129_v35 = vld [vmem:[%s3102_s6] sm:$0xff]  ;;  %s2462_s18 = smov 96   ;;  %s2463_s19 = smov 120   ;;  %vm169_vm8 = vcmask 64512  }
  0x13   :  { %74 = vadd.xlane.f32.xlu0 %v73_v12  ;;  %v76_v14 = vsel %vm72_vm0, %v2589_v13, 0.0  ;;  %v2335_v50 = vld [vmem:[%s3101_s5] ss:$0 sm:$0xff]  ;;  %s2465_s21 = smov 80   ;;  %s2466_s22 = smov 112  }
  0x14   :  { %152 = vmatpush.msra.mxu0 %v131_v33  ;;  %v70_v5 = vld [vmem:[%s3100_s4] sm:$0x3]  ;;  %s2464_s4 = smov 64   ;;  %s2467_s23 = smov 56  }
  0x15   :  { %v2649_v6 = vperm.slane %v70_v5, 0  ;;  %v224_v12 = vrot.slane %v70_v5, 1  ;;  %s2468_s2 = smov 72   ;;  %s3118_s3 = smov 104  }
  0x16   :  { %153 = vmatpush.msra.mxu0 %v130_v34  ;;  %s2470_s12 = smov 48   ;;  %s3116_s28 = smov 40  }
  0x17   :  { %s3127_s25 = sld [smem:[#allocation7_spill]] }
  0x18   :  { %v2345_v16 = vpop.eup %2344  ;;  %154 = vmatpush.msra.mxu0 %v129_v35 }
  0x19   :  { %v80_v17 = vmul.f32 32.0, %v2345_v16  ;;  %vm84_vm1 = vweird.f32 %v2345_v16 }
  0x1b   :  { %77 = vadd.xlane.f32.xlu0 %v76_v14  ;;  %v81_v18 = vsub.f32 1.0, %v80_v17  ;;  %v2653_v14 = vperm.slane %v224_v12, 0 }
  0x1d   :  { %v82_v19 = vmul.f32 %v2345_v16, %v81_v18 }
  0x1f   :  { %v83_v20 = vadd.f32 %v2345_v16, %v82_v19 }
  0x21   :  { %v2593_v21 = vsel %vm84_vm1, %v2345_v16, %v83_v20 }
  0x86   :  { %v75_v22 = vpop.xlane.xlu0 %74 }
  0x87   :  { %v86_v23 = vmul.f32 %v2593_v21, %v75_v22 }
  0x89   :  { %v88_v24 = vsub.f32 %v2585_v10, %v86_v23 }
  0x8b   :  { %v90_v25 = vmul.f32 %v88_v24, %v88_v24 }
  0x8d   :  { %v92_v26 = vsel %vm72_vm0, %v90_v25, 0.0 }
  0x8e   :  { %93 = vadd.xlane.f32.xlu1 %v92_v26  ;;  %v78_v27 = vpop.xlane.xlu0 %77 }
  0x8f   :  { %v87_v28 = vmul.f32 %v2593_v21, %v78_v27 }
  0x91   :  { %v89_v29 = vsub.f32 %v2589_v13, %v87_v28 }
  0x93   :  { %v91_v30 = vmul.f32 %v89_v29, %v89_v29 }
  0x95   :  { %v95_v31 = vsel %vm72_vm0, %v91_v30, 0.0 }
  0x96   :  { %96 = vadd.xlane.f32.xlu1 %v95_v31 }
 0x101   :  { %v94_v36 = vpop.xlane.xlu1 %93 }
 0x102   :  { %v98_v37 = vmul.f32 %v94_v36, %v2593_v21 }
 0x104   :  { %v100_v38 = vadd.f32 1e-05, %v98_v37 }
 0x106   :  { %2346 = vrsqrt.f32 %v100_v38  ;;  %vm108_vm3 = vweird.f32 %v100_v38 }
 0x109   :  { %v97_v39 = vpop.xlane.xlu1 %96 }
 0x10a   :  { %v99_v40 = vmul.f32 %v97_v39, %v2593_v21 }
 0x10c   :  { %v2347_v41 = vpop.eup %2346  ;;  %v101_v42 = vadd.f32 1e-05, %v99_v40 }
 0x10d   :  { %v103_v43 = vmul.f32 %v2347_v41, %v100_v38  ;;  %vm109_vm2 = vweird.f32 %v2347_v41 }
 0x10e   :  { %2348 = vrsqrt.f32 %v101_v42  ;;  %vm110_vm4 = vmor %vm108_vm3, %vm109_vm2  ;;  %vm118_vm5 = vweird.f32 %v101_v42 }
 0x10f   :  { %v104_v44 = vmul.f32 %v2347_v41, %v103_v43 }
 0x111   :  { %v105_v45 = vmul.f32 0.5, %v104_v44 }
 0x113   :  { %v106_v46 = vsub.f32 1.5, %v105_v45 }
 0x114   :  { %v2349_v47 = vpop.eup %2348 }
 0x115   :  { %v107_v48 = vmul.f32 %v2347_v41, %v106_v46  ;;  %v113_v49 = vmul.f32 %v2349_v47, %v101_v42  ;;  %vm119_vm6 = vweird.f32 %v2349_v47 }
 0x116   :  { %vm120_vm7 = vmor %vm118_vm5, %vm119_vm6 }
 0x117   :  { %v114_v51 = vmul.f32 %v2349_v47, %v113_v49  ;;  %v111_v52 = vsel %vm110_vm4, %v2347_v41, %v107_v48 }
 0x118   :  { %v122_v53 = vmul.f32 %v111_v52, %v88_v24 }
 0x119   :  { %v115_v54 = vmul.f32 0.5, %v114_v51 }
 0x11a   :  { %v127_v55 = vmul.f32 %v2335_v50, %v122_v53 }
 0x11b   :  { %v116_v56 = vsub.f32 1.5, %v115_v54 }
 0x11c   :  { %2222 = vmatmul.msk.f32.vlgmr.msra.gmra.mxu0 %vm72_vm0, %v127_v55 }
 0x11d   :  { %v117_v57 = vmul.f32 %v2349_v47, %v116_v56 }
 0x11f   :  { %v121_v58 = vsel %vm120_vm7, %v2349_v47, %v117_v57 }
 0x120   :  { %v123_v59 = vmul.f32 %v121_v58, %v89_v29 }
 0x122   :  { %v128_v60 = vmul.f32 %v2335_v50, %v123_v59 }
 0x124   :  { %2223 = vmatmul.msk.f32.gmra.mxu0 %vm72_vm0, %v128_v60 }
 0x199   :  { %v2620_v61 = vpop.f32.mrf.mxu0 }
 0x19a   :  { %333 = vrot.lane.b32.xlu0 %v2620_v61, %s2461_s30  ;;  %167 = vrot.lane.b32.xlu2 %v2620_v61, %s2462_s18 }
 0x19b   :  { %331 = vrot.lane.b32.xlu1 %v2620_v61, %s2463_s19 }
 0x1a1   :  { %v2628_v62 = vpop.f32.mrf.mxu0 }
 0x1a2   :  { %195 = vrot.lane.b32.xlu2 %v2628_v62, %s2462_s18 }
 0x1aa   :  { %361 = vrot.lane.b32.xlu2 %v2628_v62, %s2461_s30 }
 0x1b2   :  { %359 = vrot.lane.b32.xlu2 %v2628_v62, %s2463_s19 }
 0x1f4   :  { %v168_v63 = vpop.permute.xlu2 %167 }
 0x1f5   :  { %2224 = vmatpush.xpose.msk.msra.mxu1 %vm169_vm8, %v168_v63 }
 0x1f8   :  { %2225 = vmatmul.msk.f32.vlgmr.msra.gmra.mxu1 %vm169_vm8, %v2620_v61 }
 0x1fc   :  { %v196_v0 = vpop.permute.xlu2 %195 }
 0x1fd   :  { %2226 = vmatpush.xpose.msk.msra.mxu2 %vm169_vm8, %v196_v0 }
 0x200   :  { %2227 = vmatmul.msk.f32.vlgmr.msra.gmra.mxu2 %vm169_vm8, %v2628_v62 }
 0x204   :  { %v362_v1 = vpop.permute.xlu2 %361 }
 0x205   :  { %2232 = vmatpush.xpose.msk.msrb.mxu2 %vm169_vm8, %v362_v1 }
 0x20c   :  { %v360_v2 = vpop.permute.xlu2 %359  ;;  %v334_v3 = vpop.permute.xlu0 %333 }
 0x20d   :  { %2230 = vmatpush.xpose.msk.msrb.mxu1 %vm169_vm8, %v334_v3  ;;  %2233 = vmatmul.msk.f32.vlgmr.msrb.gmra.mxu2 %vm169_vm8, %v360_v2  ;;  %v332_v4 = vpop.permute.xlu1 %331 }
 0x210   :  { %2231 = vmatmul.msk.f32.vlgmr.msrb.gmra.mxu1 %vm169_vm8, %v332_v4 }
 0x275   :  { %v191_v7 = vpop.f32.mrf.mxu1 }
 0x276   :  { %v221_v8 = vmul.f32 0.35355338, %v191_v7 }
 0x278   :  { %v229_v9 = vadd.f32 %v2649_v6, %v221_v8 }
 0x27a   :  { %v231_v11 = vsel %vm169_vm8, %v229_v9, -inf }
 0x27b   :  { %232 = vmax.xlane.f32.xlu2 %v231_v11 }
 0x283   :  { %v218_v15 = vpop.f32.mrf.mxu2 }
 0x284   :  { %v222_v16 = vmul.f32 0.35355338, %v218_v15 }
 0x286   :  { %v230_v17 = vadd.f32 %v2653_v14, %v222_v16 }
 0x288   :  { %v234_v18 = vsel %vm169_vm8, %v230_v17, -inf }
 0x289   :  { %235 = vmax.xlane.f32.xlu0 %v234_v18 }
 0x28d   :  { %v356_v19 = vpop.f32.mrf.mxu1 }
 0x28e   :  { %v387_v20 = vmul.f32 0.35355338, %v356_v19 }
 0x290   :  { %v389_v22 = vadd.f32 %v387_v20, %v2649_v6  ;;  %v384_v39 = vpop.f32.mrf.mxu2 }
 0x291   :  { %v388_v40 = vmul.f32 0.35355338, %v384_v39  ;;  %v163_v39 = vld [vmem:[%s3103_s7 + $0x8] sm:$0xff] }
 0x292   :  { %v391_v23 = vsel %vm169_vm8, %v389_v22, -inf  ;;  %512 = vmatpush.msra.mxu2 %v163_v39 }
 0x293   :  { %392 = vmax.xlane.f32.xlu1 %v391_v23  ;;  %v2683_v41 = vadd.f32 %v388_v40, %v2653_v14  ;;  %v162_v23 = vld [vmem:[%s3103_s7] sm:$0xff] }
 0x294   :  { %541 = vmatpush.msrb.mxu0 %v162_v23 }
 0x295   :  { %v394_v42 = vsel %vm169_vm8, %v2683_v41, -inf }
 0x29d   :  { %305 = vrot.lane.b32.xlu0 %v2628_v62, %s2464_s4 }
 0x2ee   :  { %v233_v24 = vpop.xlane.xlu2 %232 }
 0x2ef   :  { %v237_v25 = vsub.f32 %v229_v9, %v233_v24 }
 0x2f1   :  { %v239_v26 = vmul.f32 1.442695, %v237_v25 }
 0x2f3   :  { %2350 = vpow2.f32 %v239_v26 }
 0x2f9   :  { %v2351_v27 = vpop.eup %2350 }
 0x2fa   :  { %v243_v28 = vsel %vm169_vm8, %v2351_v27, 0.0 }
 0x2fb   :  { %244 = vadd.xlane.f32.xlu2 %v243_v28 }
 0x2fc   :  { %v236_v29 = vpop.xlane.xlu0 %235 }
 0x2fd   :  { %v238_v30 = vsub.f32 %v230_v17, %v236_v29 }
 0x2ff   :  { %v241_v31 = vmul.f32 1.442695, %v238_v30 }
 0x301   :  { %2352 = vpow2.f32 %v241_v31 }
 0x306   :  { %v393_v32 = vpop.xlane.xlu1 %392 }
 0x307   :  { %v2662_v33 = vpop.eup %2352  ;;  %v397_v34 = vsub.f32 %v389_v22, %v393_v32 }
 0x308   :  { %v246_v35 = vsel %vm169_vm8, %v2662_v33, 0.0 }
 0x309   :  { %v399_v36 = vmul.f32 1.442695, %v397_v34  ;;  %247 = vadd.xlane.f32.xlu0 %v246_v35 }
 0x30b   :  { %2354 = vpow2.f32 %v399_v36 }
 0x30f   :  { %v306_v44 = vpop.permute.xlu0 %305 }
 0x311   :  { %v2666_v37 = vpop.eup %2354 }
 0x312   :  { %v403_v38 = vsel %vm169_vm8, %v2666_v37, 0.0 }
 0x313   :  { %279 = vrot.lane.b32.xlu2 %v2620_v61, %s2464_s4  ;;  %404 = vadd.xlane.f32.xlu1 %v403_v38 }
 0x31b   :  { %551 = vrot.lane.b32.xlu2 %v2620_v61, %s2465_s21 }
 0x31d   :  { %549 = vrot.lane.b32.xlu0 %v2620_v61, %s2466_s22 }
 0x32c   :  { %439 = vrot.lane.b32.xlu1 %v2620_v61, %s2467_s23 }
 0x334   :  { %465 = vrot.lane.b32.xlu1 %v2628_v62, %s2467_s23 }
 0x33c   :  { %579 = vrot.lane.b32.xlu1 %v2628_v62, %s2465_s21 }
 0x344   :  { %395 = vmax.xlane.f32.xlu2 %v394_v42  ;;  %577 = vrot.lane.b32.xlu1 %v2628_v62, %s2466_s22 }
 0x34c   :  { %742 = vrot.lane.b32.xlu1 %v2620_v61, %s2468_s2 }
 0x354   :  { %740 = vrot.lane.b32.xlu1 %v2620_v61, %s3118_s3 }
 0x35c   :  { %657 = vrot.lane.b32.xlu1 %v2620_v61, %s2470_s12 }
 0x36e   :  { %v245_v43 = vpop.xlane.xlu2 %244 }
 0x36f   :  { %2356 = vrcp.f32 %v245_v43  ;;  %v260_v49 = vand.u32 2147483648, %v245_v43  ;;  %v258_v51 = vand.u32 2147483647, %v245_v43  ;;  %vm254_vm10 = vweird.f32 %v245_v43 }
 0x371   :  { %v261_v54 = vor.u32 1.1754944e-38, %v260_v49  ;;  %vm259_vm12 = vcmp.eq.f32.partialorder %v258_v51, 8.507059e+37 }
 0x375   :  { %v2357_v45 = vpop.eup %2356 }
 0x376   :  { %v250_v46 = vmul.f32 %v2357_v45, %v245_v43  ;;  %v280_v47 = vpop.permute.xlu2 %279  ;;  %vm255_vm9 = vweird.f32 %v2357_v45 }
 0x377   :  { %300 = vmatpush.msra.mxu3 %v280_v47  ;;  %vm256_vm11 = vmor %vm254_vm10, %vm255_vm9 }
 0x378   :  { %v251_v48 = vsub.f32 1.0, %v250_v46 }
 0x379   :  { %326 = vmatpush.msrb.mxu3 %v306_v44 }
 0x37a   :  { %v252_v50 = vmul.f32 %v2357_v45, %v251_v48 }
 0x37c   :  { %v248_v52 = vpop.xlane.xlu0 %247  ;;  %v253_v53 = vadd.f32 %v2357_v45, %v252_v50 }
 0x37d   :  { %2358 = vrcp.f32 %v248_v52  ;;  %v275_v0 = vand.u32 2147483648, %v248_v52  ;;  %v273_v2 = vand.u32 2147483647, %v248_v52  ;;  %vm269_vm14 = vweird.f32 %v248_v52 }
 0x37e   :  { %v257_v55 = vsel %vm256_vm11, %v2357_v45, %v253_v53  ;;  %v552_v26 = vpop.permute.xlu2 %551 }
 0x37f   :  { %v262_v56 = vsel %vm259_vm12, %v261_v54, %v257_v55  ;;  %v276_v4 = vor.u32 1.1754944e-38, %v275_v0  ;;  %vm274_vm1 = vcmp.eq.f32.partialorder %v273_v2, 8.507059e+37 }
 0x380   :  { %v263_v57 = vmul.f32 %v2351_v27, %v262_v56 }
 0x382   :  { %2228 = vmatmul.msk.f32.vlgmr.msra.gmra.mxu3 %vm169_vm8, %v263_v57 }
 0x383   :  { %v2359_v58 = vpop.eup %2358 }
 0x384   :  { %v265_v59 = vmul.f32 %v2359_v58, %v248_v52  ;;  %vm270_vm13 = vweird.f32 %v2359_v58 }
 0x385   :  { %vm271_vm15 = vmor %vm269_vm14, %vm270_vm13 }
 0x386   :  { %v266_v60 = vsub.f32 1.0, %v265_v59  ;;  %v405_v63 = vpop.xlane.xlu1 %404 }
 0x387   :  { %2360 = vrcp.f32 %v405_v63  ;;  %v420_v17 = vand.u32 2147483648, %v405_v63  ;;  %vm414_vm3 = vweird.f32 %v405_v63  ;;  %v418_v18 = vand.u32 2147483647, %v405_v63 }
 0x388   :  { %v267_v1 = vmul.f32 %v2359_v58, %v266_v60 }
 0x389   :  { %v421_v20 = vor.u32 1.1754944e-38, %v420_v17  ;;  %vm419_vm5 = vcmp.eq.f32.partialorder %v418_v18, 8.507059e+37 }
 0x38a   :  { %v268_v3 = vadd.f32 %v2359_v58, %v267_v1 }
 0x38c   :  { %v272_v5 = vsel %vm271_vm15, %v2359_v58, %v268_v3 }
 0x38d   :  { %v2361_v7 = vpop.eup %2360  ;;  %v277_v8 = vsel %vm274_vm1, %v276_v4, %v272_v5 }
 0x38e   :  { %v410_v9 = vmul.f32 %v2361_v7, %v405_v63  ;;  %v278_v11 = vmul.f32 %v2662_v33, %v277_v8  ;;  %vm415_vm2 = vweird.f32 %v2361_v7 }
 0x38f   :  { %vm416_vm4 = vmor %vm414_vm3, %vm415_vm2  ;;  %v550_v28 = vpop.permute.xlu0 %549 }
 0x390   :  { %v411_v12 = vsub.f32 1.0, %v410_v9  ;;  %2229 = vmatmul.msk.f32.vlgmr.msrb.gmra.mxu3 %vm169_vm8, %v278_v11 }
 0x392   :  { %v412_v15 = vmul.f32 %v2361_v7, %v411_v12 }
 0x394   :  { %v413_v16 = vadd.f32 %v2361_v7, %v412_v15 }
 0x396   :  { %v417_v19 = vsel %vm416_vm4, %v2361_v7, %v413_v16 }
 0x397   :  { %v422_v22 = vsel %vm419_vm5, %v421_v20, %v417_v19 }
 0x398   :  { %v423_v25 = vmul.f32 %v2666_v37, %v422_v22 }
 0x39e   :  { %v440_v24 = vpop.permute.xlu1 %439 }
 0x39f   :  { %460 = vmatpush.msra.mxu3 %v440_v24 }
 0x3a0   :  { %2234 = vmatmul.msk.f32.vlgmr.msra.gmra.mxu3 %vm169_vm8, %v423_v25 }
 0x3a1   :  { %2240 = vmatpush.xpose.msk.msrb.mxu3 %vm169_vm8, %v552_v26 }
 0x3a6   :  { %v466_v27 = vpop.permute.xlu1 %465 }
 0x3a7   :  { %486 = vmatpush.msra.mxu1 %v466_v27 }
 0x3a8   :  { %2241 = vmatmul.msk.f32.vlgmr.msrb.gmra.mxu3 %vm169_vm8, %v550_v28 }
 0x3ae   :  { %v580_v29 = vpop.permute.xlu1 %579 }
 0x3af   :  { %2242 = vmatpush.xpose.msk.msrb.mxu1 %vm169_vm8, %v580_v29 }
 0x3b6   :  { %v578_v30 = vpop.permute.xlu1 %577 }
 0x3b7   :  { %v396_v31 = vpop.xlane.xlu2 %395 }
 0x3b8   :  { %v398_v32 = vsub.f32 %v2683_v41, %v396_v31 }
 0x3ba   :  { %v401_v33 = vmul.f32 1.442695, %v398_v32 }
 0x3bc   :  { %2362 = vpow2.f32 %v401_v33 }
 0x3be   :  { %v743_v34 = vpop.permute.xlu1 %742 }
 0x3bf   :  { %2248 = vmatpush.xpose.msk.msra.mxu0 %vm169_vm8, %v743_v34 }
 0x3c2   :  { %v2363_v35 = vpop.eup %2362 }
 0x3c3   :  { %v406_v36 = vsel %vm169_vm8, %v2363_v35, 0.0 }
 0x3c4   :  { %407 = vadd.xlane.f32.xlu0 %v406_v36 }
 0x3c6   :  { %v741_v37 = vpop.permute.xlu1 %740 }
 0x3ce   :  { %v658_v38 = vpop.permute.xlu1 %657 }
 0x3cf   :  { %678 = vmatpush.msra.mxu3 %v658_v38 }
 0x405   :  { %v302_v40 = vpop.f32.mrf.mxu3 }
 0x406   :  { %2238 = vmatmul.msk.f32.vlgmr.msrb.gmra.mxu0 %vm169_vm8, %v302_v40 }
 0x413   :  { %v328_v41 = vpop.f32.mrf.mxu3 }
 0x414   :  { %2239 = vmatmul.msk.f32.gmra.mxu0 %vm169_vm8, %v328_v41  ;;  %v164_v41 = vld [vmem:[%s3103_s7 + $0x10] sm:$0xff] }
 0x415   :  { %730 = vmatpush.msrb.mxu2 %v164_v41 }
 0x41c   :  { %2249 = vmatmul.msk.f32.vlgmr.msra.gmra.mxu0 %vm169_vm8, %v741_v37 }
 0x423   :  { %v462_v42 = vpop.f32.mrf.mxu3 }
 0x424   :  { %2236 = vmatmul.msk.f32.vlgmr.msra.gmra.mxu2 %vm169_vm8, %v462_v42 }
 0x42b   :  { %v574_v43 = vpop.f32.mrf.mxu3 }
 0x42c   :  { %v605_v44 = vmul.f32 0.35355338, %v574_v43 }
 0x42e   :  { %v607_v45 = vadd.f32 %v605_v44, %v2649_v6 }
 0x430   :  { %v609_v46 = vsel %vm169_vm8, %v607_v45, -inf }
 0x431   :  { %610 = vmax.xlane.f32.xlu2 %v609_v46 }
 0x437   :  { %v408_v47 = vpop.xlane.xlu0 %407 }
 0x438   :  { %2364 = vrcp.f32 %v408_v47  ;;  %v435_v51 = vand.u32 2147483648, %v408_v47  ;;  %v433_v53 = vand.u32 2147483647, %v408_v47  ;;  %vm429_vm7 = vweird.f32 %v408_v47 }
 0x43a   :  { %v436_v55 = vor.u32 1.1754944e-38, %v435_v51  ;;  %vm434_vm10 = vcmp.eq.f32.partialorder %v433_v53, 8.507059e+37 }
 0x43e   :  { %v2365_v48 = vpop.eup %2364 }
 0x43f   :  { %v425_v49 = vmul.f32 %v2365_v48, %v408_v47  ;;  %vm430_vm6 = vweird.f32 %v2365_v48 }
 0x440   :  { %vm431_vm9 = vmor %vm429_vm7, %vm430_vm6 }
 0x441   :  { %v426_v50 = vsub.f32 1.0, %v425_v49 }
 0x443   :  { %v427_v52 = vmul.f32 %v2365_v48, %v426_v50 }
 0x445   :  { %v428_v54 = vadd.f32 %v2365_v48, %v427_v52 }
 0x447   :  { %v432_v56 = vsel %vm431_vm9, %v2365_v48, %v428_v54 }
 0x448   :  { %v437_v57 = vsel %vm434_vm10, %v436_v55, %v432_v56 }
 0x449   :  { %770 = vrot.lane.b32.xlu2 %v2628_v62, %s2468_s2  ;;  %v438_v58 = vmul.f32 %v2363_v35, %v437_v57 }
 0x44b   :  { %2235 = vmatmul.msk.f32.vlgmr.msra.gmra.mxu1 %vm169_vm8, %v438_v58 }
 0x453   :  { %2243 = vmatmul.msk.f32.vlgmr.msrb.gmra.mxu1 %vm169_vm8, %v578_v30 }
 0x483   :  { %v2727_v5 = vpop.f32.mrf.mxu0 }
 0x491   :  { %v2731_v11 = vpop.f32.mrf.mxu0 }
 0x499   :  { %v765_v12 = vpop.f32.mrf.mxu0 }
 0x49a   :  { %v796_v15 = vmul.f32 0.35355338, %v765_v12 }
 0x49c   :  { %v798_v16 = vadd.f32 %v796_v15, %v2649_v6 }
 0x49e   :  { %v800_v17 = vsel %vm169_vm8, %v798_v16, -inf }
 0x4a4   :  { %v611_v59 = vpop.xlane.xlu2 %610 }
 0x4a5   :  { %v615_v60 = vsub.f32 %v607_v45, %v611_v59 }
 0x4a7   :  { %v617_v63 = vmul.f32 1.442695, %v615_v60 }
 0x4a9   :  { %2366 = vpow2.f32 %v617_v63 }
 0x4ac   :  { %v771_v0 = vpop.permute.xlu2 %770 }
 0x4ad   :  { %2250 = vmatpush.xpose.msk.msrb.mxu3 %vm169_vm8, %v771_v0 }
 0x4af   :  { %v2367_v1 = vpop.eup %2366 }
 0x4b0   :  { %v621_v2 = vsel %vm169_vm8, %v2367_v1, 0.0 }
 0x4b1   :  { %622 = vadd.xlane.f32.xlu0 %v621_v2 }
 0x4c5   :  { %768 = vrot.lane.b32.xlu0 %v2628_v62, %s3118_s3 }
 0x4c8   :  { %v488_v3 = vpop.f32.mrf.mxu1 }
 0x4c9   :  { %2237 = vmatmul.msk.f32.gmra.mxu2 %vm169_vm8, %v488_v3 }
 0x4d0   :  { %v602_v4 = vpop.f32.mrf.mxu1 }
 0x4d1   :  { %v606_v7 = vmul.f32 0.35355338, %v602_v4 }
 0x4d3   :  { %v608_v8 = vadd.f32 %v606_v7, %v2653_v14 }
 0x4d5   :  { %v612_v9 = vsel %vm169_vm8, %v608_v8, -inf }
 0x4d6   :  { %613 = vmax.xlane.f32.xlu1 %v612_v9 }
 0x4ef   :  { %801 = vmax.xlane.f32.xlu0 %v800_v17 }
 0x503   :  { %848 = vrot.lane.b32.xlu0 %v2620_v61, %s3116_s28 }
 0x524   :  { %v623_v18 = vpop.xlane.xlu0 %622 }
 0x525   :  { %2368 = vrcp.f32 %v623_v18  ;;  %v638_v23 = vand.u32 2147483648, %v623_v18  ;;  %v636_v25 = vand.u32 2147483647, %v623_v18  ;;  %vm632_vm12 = vweird.f32 %v623_v18 }
 0x527   :  { %v639_v27 = vor.u32 1.1754944e-38, %v638_v23  ;;  %vm637_vm14 = vcmp.eq.f32.partialorder %v636_v25, 8.507059e+37  ;;  %v165_v23 = vld [vmem:[%s3103_s7 + $0x18] sm:$0xff] }
 0x52b   :  { %v2369_v19 = vpop.eup %2368 }
 0x52c   :  { %v628_v20 = vmul.f32 %v2369_v19, %v623_v18  ;;  %vm633_vm11 = vweird.f32 %v2369_v19 }
 0x52d   :  { %vm634_vm13 = vmor %vm632_vm12, %vm633_vm11 }
 0x52e   :  { %v629_v22 = vsub.f32 1.0, %v628_v20 }
 0x530   :  { %v630_v24 = vmul.f32 %v2369_v19, %v629_v22 }
 0x532   :  { %v631_v26 = vadd.f32 %v2369_v19, %v630_v24 }
 0x534   :  { %v635_v28 = vsel %vm634_vm13, %v2369_v19, %v631_v26 }
 0x535   :  { %v640_v29 = vsel %vm637_vm14, %v639_v27, %v635_v28 }
 0x536   :  { %v641_v30 = vmul.f32 %v2367_v1, %v640_v29 }
 0x537   :  { %v769_v61 = vpop.permute.xlu0 %768 }
 0x538   :  { %2244 = vmatmul.msk.f32.vlgmr.msra.gmra.mxu3 %vm169_vm8, %v641_v30 }
 0x539   :  { %921 = vmatpush.msra.mxu3 %v165_v23 }
 0x540   :  { %2251 = vmatmul.msk.f32.vlgmr.msrb.gmra.mxu3 %vm169_vm8, %v769_v61 }
 0x549   :  { %v614_v31 = vpop.xlane.xlu1 %613 }
 0x54a   :  { %v616_v32 = vsub.f32 %v608_v8, %v614_v31 }
 0x54c   :  { %v619_v33 = vmul.f32 1.442695, %v616_v32 }
 0x54e   :  { %2370 = vpow2.f32 %v619_v33 }
 0x554   :  { %v2371_v34 = vpop.eup %2370 }
 0x555   :  { %v624_v35 = vsel %vm169_vm8, %v2371_v34, 0.0 }
 0x556   :  { %625 = vadd.xlane.f32.xlu2 %v624_v35 }
 0x562   :  { %v802_v36 = vpop.xlane.xlu0 %801 }
 0x563   :  { %v806_v37 = vsub.f32 %v798_v16, %v802_v36 }
 0x565   :  { %v808_v38 = vmul.f32 1.442695, %v806_v37  ;;  %v514_v37 = vpop.f32.mrf.mxu2 }
 0x567   :  { %2372 = vpow2.f32 %v808_v38 }
 0x56d   :  { %v2373_v39 = vpop.eup %2372  ;;  %v517_v38 = vpop.f32.mrf.mxu2 }
 0x56e   :  { %v812_v40 = vsel %vm169_vm8, %v2373_v39, 0.0 }
 0x56f   :  { %813 = vadd.xlane.f32.xlu1 %v812_v40  ;;  %v544_v40 = vadd.f32 %v2727_v5, %v514_v37 }
 0x575   :  { %v849_v7 = vpop.permute.xlu0 %848 }
 0x588   :  { %683 = vrot.lane.b32.xlu1 %v2628_v62, %s2470_s12 }
 0x590   :  { %874 = vrot.lane.b32.xlu1 %v2628_v62, %s3116_s28 }
 0x5bb   :  { %v680_v42 = vpop.f32.mrf.mxu3 }
 0x5bc   :  { %2246 = vmatmul.msk.f32.vlgmr.msrb.gmra.mxu2 %vm169_vm8, %v680_v42 }
 0x5c3   :  { %v793_v43 = vpop.f32.mrf.mxu3 }
 0x5c4   :  { %v797_v44 = vmul.f32 0.35355338, %v793_v43 }
 0x5c6   :  { %v799_v45 = vadd.f32 %v797_v44, %v2653_v14 }
 0x5c8   :  { %v803_v46 = vsel %vm169_vm8, %v799_v45, -inf }
 0x5c9   :  { %804 = vmax.xlane.f32.xlu2 %v803_v46  ;;  %v626_v47 = vpop.xlane.xlu2 %625 }
 0x5ca   :  { %2374 = vrcp.f32 %v626_v47  ;;  %v653_v56 = vand.u32 2147483648, %v626_v47  ;;  %vm647_vm1 = vweird.f32 %v626_v47  ;;  %v651_v57 = vand.u32 2147483647, %v626_v47 }
 0x5cc   :  { %v654_v60 = vor.u32 1.1754944e-38, %v653_v56  ;;  %vm652_vm3 = vcmp.eq.f32.partialorder %v651_v57, 8.507059e+37  ;;  %v986_v56 = vld [vmem:[%s3105_s9 + $0x18] sm:$0xff]  ;;  %v985_v57 = vld [vmem:[%s3105_s9 + $0x10] sm:$0xff] }
 0x5d0   :  { %v2375_v48 = vpop.eup %2374 }
 0x5d1   :  { %v643_v62 = vmul.f32 %v2375_v48, %v626_v47  ;;  %vm648_vm15 = vweird.f32 %v2375_v48 }
 0x5d2   :  { %vm649_vm2 = vmor %vm647_vm1, %vm648_vm15  ;;  %vm1026_vm1 = vcmask 523264  }
 0x5d3   :  { %v644_v50 = vsub.f32 1.0, %v643_v62 }
 0x5d5   :  { %v645_v52 = vmul.f32 %v2375_v48, %v644_v50 }
 0x5d7   :  { %v646_v54 = vadd.f32 %v2375_v48, %v645_v52 }
 0x5d9   :  { %v650_v58 = vsel %vm649_vm2, %v2375_v48, %v646_v54 }
 0x5da   :  { %v655_v63 = vsel %vm652_vm3, %v654_v60, %v650_v58 }
 0x5db   :  { %v656_v4 = vmul.f32 %v2371_v34, %v655_v63 }
 0x5e2   :  { %v814_v49 = vpop.xlane.xlu1 %813 }
 0x5e3   :  { %2376 = vrcp.f32 %v814_v49  ;;  %v829_v1 = vand.u32 2147483648, %v814_v49  ;;  %vm823_vm5 = vweird.f32 %v814_v49  ;;  %v827_v2 = vand.u32 2147483647, %v814_v49 }
 0x5e5   :  { %v830_v9 = vor.u32 1.1754944e-38, %v829_v1  ;;  %vm828_vm7 = vcmp.eq.f32.partialorder %v827_v2, 8.507059e+37 }
 0x5e9   :  { %v2377_v51 = vpop.eup %2376 }
 0x5ea   :  { %v819_v53 = vmul.f32 %v2377_v51, %v814_v49  ;;  %vm824_vm4 = vweird.f32 %v2377_v51 }
 0x5eb   :  { %vm825_vm6 = vmor %vm823_vm5, %vm824_vm4 }
 0x5ec   :  { %v820_v55 = vsub.f32 1.0, %v819_v53 }
 0x5ee   :  { %v821_v59 = vmul.f32 %v2377_v51, %v820_v55 }
 0x5f0   :  { %v822_v0 = vadd.f32 %v2377_v51, %v821_v59 }
 0x5f2   :  { %v826_v8 = vsel %vm825_vm6, %v2377_v51, %v822_v0 }
 0x5f3   :  { %v831_v12 = vsel %vm828_vm7, %v830_v9, %v826_v8 }
 0x5f4   :  { %v832_v16 = vmul.f32 %v2373_v39, %v831_v12 }
 0x5fa   :  { %v684_v3 = vpop.permute.xlu1 %683 }
 0x5fb   :  { %704 = vmatpush.msra.mxu1 %v684_v3 }
 0x5fc   :  { %2245 = vmatmul.msk.f32.vlgmr.msra.gmra.mxu1 %vm169_vm8, %v656_v4 }
 0x5fd   :  { %869 = vmatpush.msrb.mxu1 %v849_v7  ;;  %v2336_v7 = vld [vmem:[%s3104_s8] ss:$0 sm:$0xff] }
 0x5ff   :  { %1005 = vmatpush.msra.mxu1 %v986_v56 }
 0x601   :  { %1006 = vmatpush.msra.mxu1 %v985_v57 }
 0x602   :  { %v875_v15 = vpop.permute.xlu1 %874 }
 0x603   :  { %895 = vmatpush.msrb.mxu0 %v875_v15  ;;  %v1025_v15 = vld [vmem:[%s3106_s10 + $0x38] sm:$0xff] }
 0x604   :  { %2252 = vmatmul.msk.f32.vlgmr.msrb.gmra.mxu1 %vm169_vm8, %v832_v16  ;;  %v1024_v16 = vld [vmem:[%s3106_s10 + $0x30] sm:$0xff]  ;;  %1041 = vmatpush.msra.mxu2 %v1025_v15 }
 0x606   :  { %1042 = vmatpush.msra.mxu2 %v1024_v16 }
 0x63c   :  { %v805_v17 = vpop.xlane.xlu2 %804 }
 0x63d   :  { %v807_v18 = vsub.f32 %v799_v45, %v805_v17  ;;  %v1023_v17 = vld [vmem:[%s3106_s10 + $0x28] sm:$0xff] }
 0x63e   :  { %1043 = vmatpush.msra.mxu2 %v1023_v17 }
 0x63f   :  { %v810_v19 = vmul.f32 1.442695, %v807_v18  ;;  %v732_v39 = vpop.f32.mrf.mxu2  ;;  %v1022_v18 = vld [vmem:[%s3106_s10 + $0x20] sm:$0xff] }
 0x640   :  { %v738_v41 = vadd.f32 %v732_v39, %v544_v40  ;;  %1044 = vmatpush.msra.mxu2 %v1022_v18 }
 0x641   :  { %2378 = vpow2.f32 %v810_v19  ;;  %v1021_v19 = vld [vmem:[%s3106_s10 + $0x18] sm:$0xff] }
 0x642   :  { %1045 = vmatpush.msra.mxu2 %v1021_v19 }
 0x647   :  { %v2379_v20 = vpop.eup %2378 }
 0x648   :  { %v815_v22 = vsel %vm169_vm8, %v2379_v20, 0.0 }
 0x649   :  { %816 = vadd.xlane.f32.xlu2 %v815_v22 }
 0x679   :  { %v706_v24 = vpop.f32.mrf.mxu1 }
 0x67a   :  { %2247 = vmatmul.msk.f32.gmra.mxu2 %vm169_vm8, %v706_v24 }
 0x681   :  { %v871_v25 = vpop.f32.mrf.mxu1 }
 0x682   :  { %2254 = vmatmul.msk.f32.vlgmr.msra.gmra.mxu3 %vm169_vm8, %v871_v25 }
 0x6bc   :  { %v817_v26 = vpop.xlane.xlu2 %816 }
 0x6bd   :  { %2380 = vrcp.f32 %v817_v26  ;;  %v844_v30 = vand.u32 2147483648, %v817_v26  ;;  %v842_v31 = vand.u32 2147483647, %v817_v26  ;;  %vm838_vm10 = vweird.f32 %v817_v26 }
 0x6bf   :  { %v845_v33 = vor.u32 1.1754944e-38, %v844_v30  ;;  %vm843_vm12 = vcmp.eq.f32.partialorder %v842_v31, 8.507059e+37 }
 0x6c3   :  { %v2381_v27 = vpop.eup %2380 }
 0x6c4   :  { %v834_v28 = vmul.f32 %v2381_v27, %v817_v26  ;;  %vm839_vm9 = vweird.f32 %v2381_v27 }
 0x6c5   :  { %vm840_vm11 = vmor %vm838_vm10, %vm839_vm9 }
 0x6c6   :  { %v835_v29 = vsub.f32 1.0, %v834_v28  ;;  %v1018_v28 = vld [vmem:[%s3106_s10] sm:$0xff] }
 0x6c8   :  { %v836_v61 = vmul.f32 %v2381_v27, %v835_v29 }
 0x6ca   :  { %v837_v32 = vadd.f32 %v2381_v27, %v836_v61 }
 0x6cc   :  { %v841_v34 = vsel %vm840_vm11, %v2381_v27, %v837_v32  ;;  %v1019_v27 = vld [vmem:[%s3106_s10 + $0x8] sm:$0xff] }
 0x6cd   :  { %v846_v35 = vsel %vm843_vm12, %v845_v33, %v841_v34 }
 0x6ce   :  { %v847_v36 = vmul.f32 %v2379_v20, %v846_v35  ;;  %v1020_v20 = vld [vmem:[%s3106_s10 + $0x10] sm:$0xff] }
 0x6cf   :  { %1046 = vmatpush.msra.mxu2 %v1020_v20 }
 0x6d0   :  { %2253 = vmatmul.msk.f32.vlgmr.msrb.gmra.mxu0 %vm169_vm8, %v847_v36 }
 0x6d1   :  { %1047 = vmatpush.msra.mxu2 %v1019_v27 }
 0x6d3   :  { %1048 = vmatpush.msra.mxu2 %v1018_v28 }
 0x6fd   :  { %v735_v50 = vpop.f32.mrf.mxu2 }
 0x705   :  { %v923_v42 = vpop.f32.mrf.mxu3 }
 0x706   :  { %v929_v43 = vadd.f32 %v923_v42, %v738_v41 }
 0x708   :  { %v2762_v44 = vadd.f32 %v929_v43, %v2585_v10  ;;  %v547_v10 = vadd.f32 %v2731_v11, %v517_v38  ;;  %v984_v11 = vld [vmem:[%s3105_s9 + $0x8] sm:$0xff] }
 0x709   :  { %1007 = vmatpush.msra.mxu1 %v984_v11 }
 0x70a   :  { %v934_v45 = vsel %vm72_vm0, %v2762_v44, 0.0  ;;  %v739_v51 = vadd.f32 %v735_v50, %v547_v10 }
 0x70b   :  { %935 = vadd.xlane.f32.xlu2 %v934_v45 }
 0x74d   :  { %v897_v46 = vpop.f32.mrf.mxu0 }
 0x74e   :  { %2255 = vmatmul.msk.f32.gmra.mxu3 %vm169_vm8, %v897_v46 }
 0x77e   :  { %v936_v47 = vpop.xlane.xlu2 %935 }
 0x77f   :  { %v940_v48 = vmul.f32 %v936_v47, %v2593_v21 }
 0x781   :  { %v942_v49 = vsub.f32 %v2762_v44, %v940_v48 }
 0x783   :  { %v944_v62 = vmul.f32 %v942_v49, %v942_v49 }
 0x785   :  { %v946_v5 = vsel %vm72_vm0, %v944_v62, 0.0 }
 0x786   :  { %947 = vadd.xlane.f32.xlu0 %v946_v5 }
 0x7d1   :  { %v926_v52 = vpop.f32.mrf.mxu3 }
 0x7d2   :  { %v930_v53 = vadd.f32 %v926_v52, %v739_v51  ;;  %v2264_v52 = vld [vmem:[%s3102_s6 + $0x38] sm:$0xff] }
 0x7d3   :  { %1132 = vmatpush.msra.mxu0 %v2264_v52 }
 0x7d4   :  { %v2772_v54 = vadd.f32 %v930_v53, %v2589_v13  ;;  %v983_v13 = vld [vmem:[%s3105_s9] sm:$0xff]  ;;  %v2263_v53 = vld [vmem:[%s3102_s6 + $0x30] sm:$0xff] }
 0x7d5   :  { %1008 = vmatpush.msra.mxu1 %v983_v13  ;;  %1133 = vmatpush.msra.mxu0 %v2263_v53 }
 0x7d6   :  { %v937_v55 = vsel %vm72_vm0, %v2772_v54, 0.0 }
 0x7d7   :  { %938 = vadd.xlane.f32.xlu1 %v937_v55  ;;  %v2262_v55 = vld [vmem:[%s3102_s6 + $0x28] sm:$0xff] }
 0x7d8   :  { %1134 = vmatpush.msra.mxu0 %v2262_v55 }
 0x7f9   :  { %v948_v58 = vpop.xlane.xlu0 %947 }
 0x7fa   :  { %v952_v59 = vmul.f32 %v948_v58, %v2593_v21 }
 0x7fc   :  { %v954_v60 = vadd.f32 1e-05, %v952_v59 }
 0x7fe   :  { %2382 = vrsqrt.f32 %v954_v60  ;;  %vm962_vm14 = vweird.f32 %v954_v60 }
 0x804   :  { %v2383_v63 = vpop.eup %2382 }
 0x805   :  { %v957_v0 = vmul.f32 %v2383_v63, %v954_v60  ;;  %vm963_vm13 = vweird.f32 %v2383_v63 }
 0x806   :  { %vm964_vm15 = vmor %vm962_vm14, %vm963_vm13 }
 0x807   :  { %v958_v1 = vmul.f32 %v2383_v63, %v957_v0 }
 0x809   :  { %v959_v2 = vmul.f32 0.5, %v958_v1  ;;  %v2337_v1 = vld [vmem:[%s3101_s5 + $0x1] ss:$0 sm:$0xff] }
 0x80b   :  { %v960_v3 = vsub.f32 1.5, %v959_v2 }
 0x80d   :  { %v961_v4 = vmul.f32 %v2383_v63, %v960_v3 }
 0x80f   :  { %v965_v8 = vsel %vm964_vm15, %v2383_v63, %v961_v4 }
 0x810   :  { %v976_v9 = vmul.f32 %v965_v8, %v942_v49 }
 0x812   :  { %v981_v12 = vmul.f32 %v2336_v7, %v976_v9 }
 0x814   :  { %2256 = vmatmul.msk.f32.vlgmr.msra.gmra.mxu1 %vm72_vm0, %v981_v12 }
 0x84a   :  { %v939_v22 = vpop.xlane.xlu1 %938 }
 0x84b   :  { %v941_v23 = vmul.f32 %v939_v22, %v2593_v21 }
 0x84d   :  { %v943_v24 = vsub.f32 %v2772_v54, %v941_v23 }
 0x84f   :  { %v945_v25 = vmul.f32 %v943_v24, %v943_v24 }
 0x851   :  { %v949_v26 = vsel %vm72_vm0, %v945_v25, 0.0 }
 0x852   :  { %950 = vadd.xlane.f32.xlu2 %v949_v26 }
 0x891   :  { %v1010_v29 = vpop.f32.mrf.mxu1 }
 0x892   :  { %v1016_v30 = vmax.f32 %v1010_v29, 0.0 }
 0x894   :  { %2258 = vmatmul.msk.f32.vlgmr.msra.gmra.mxu2 %vm1026_vm1, %v1016_v30 }
 0x8c5   :  { %v951_v61 = vpop.xlane.xlu2 %950 }
 0x8c6   :  { %v953_v31 = vmul.f32 %v951_v61, %v2593_v21 }
 0x8c8   :  { %v955_v32 = vadd.f32 1e-05, %v953_v31 }
 0x8ca   :  { %2384 = vrsqrt.f32 %v955_v32  ;;  %vm972_vm3 = vweird.f32 %v955_v32 }
 0x8d0   :  { %v2385_v33 = vpop.eup %2384 }
 0x8d1   :  { %v967_v34 = vmul.f32 %v2385_v33, %v955_v32  ;;  %vm973_vm2 = vweird.f32 %v2385_v33 }
 0x8d2   :  { %vm974_vm4 = vmor %vm972_vm3, %vm973_vm2 }
 0x8d3   :  { %v968_v35 = vmul.f32 %v2385_v33, %v967_v34 }
 0x8d5   :  { %v969_v36 = vmul.f32 0.5, %v968_v35 }
 0x8d7   :  { %v970_v37 = vsub.f32 1.5, %v969_v36 }
 0x8d9   :  { %v971_v38 = vmul.f32 %v2385_v33, %v970_v37 }
 0x8db   :  { %v975_v39 = vsel %vm974_vm4, %v2385_v33, %v971_v38 }
 0x8dc   :  { %v977_v40 = vmul.f32 %v975_v39, %v943_v24 }
 0x8de   :  { %v982_v41 = vmul.f32 %v2336_v7, %v977_v40 }
 0x8e0   :  { %2257 = vmatmul.msk.f32.gmra.mxu1 %vm72_vm0, %v982_v41 }
 0x917   :  { %v1050_v42 = vpop.f32.mrf.mxu2 }
 0x918   :  { %v2824_v43 = vadd.f32 %v1050_v42, %v2762_v44 }
 0x91a   :  { %v1060_v45 = vsel %vm72_vm0, %v2824_v43, 0.0 }
 0x91b   :  { %1061 = vadd.xlane.f32.xlu2 %v1060_v45 }
 0x95d   :  { %v1013_v46 = vpop.f32.mrf.mxu1 }
 0x95e   :  { %v1017_v47 = vmax.f32 %v1013_v46, 0.0 }
 0x960   :  { %2259 = vmatmul.msk.f32.gmra.mxu2 %vm1026_vm1, %v1017_v47 }
 0x98e   :  { %v1062_v48 = vpop.xlane.xlu2 %1061 }
 0x98f   :  { %v1066_v49 = vmul.f32 %v1062_v48, %v2593_v21 }
 0x991   :  { %v1068_v62 = vsub.f32 %v2824_v43, %v1066_v49 }
 0x993   :  { %v1070_v5 = vmul.f32 %v1068_v62, %v1068_v62 }
 0x995   :  { %v1072_v50 = vsel %vm72_vm0, %v1070_v5, 0.0 }
 0x996   :  { %1073 = vadd.xlane.f32.xlu2 %v1072_v50 }
 0x9e3   :  { %v1053_v10 = vpop.f32.mrf.mxu2 }
 0x9e4   :  { %v2833_v44 = vadd.f32 %v1053_v10, %v2772_v54  ;;  %v2261_v54 = vld [vmem:[%s3102_s6 + $0x20] sm:$0xff] }
 0x9e5   :  { %1135 = vmatpush.msra.mxu0 %v2261_v54 }
 0x9e6   :  { %v1063_v51 = vsel %vm72_vm0, %v2833_v44, 0.0 }
 0x9e7   :  { %1064 = vadd.xlane.f32.xlu2 %v1063_v51 }
 0xa09   :  { %v1074_v56 = vpop.xlane.xlu2 %1073 }
 0xa0a   :  { %v1078_v57 = vmul.f32 %v1074_v56, %v2593_v21 }
 0xa0c   :  { %v1080_v11 = vadd.f32 1e-05, %v1078_v57 }
 0xa0e   :  { %2386 = vrsqrt.f32 %v1080_v11  ;;  %vm1088_vm6 = vweird.f32 %v1080_v11 }
 0xa14   :  { %v2387_v13 = vpop.eup %2386 }
 0xa15   :  { %v1083_v58 = vmul.f32 %v2387_v13, %v1080_v11  ;;  %vm1089_vm5 = vweird.f32 %v2387_v13 }
 0xa16   :  { %vm1090_vm7 = vmor %vm1088_vm6, %vm1089_vm5 }
 0xa17   :  { %v1084_v59 = vmul.f32 %v2387_v13, %v1083_v58 }
 0xa19   :  { %v1085_v60 = vmul.f32 0.5, %v1084_v59 }
 0xa1b   :  { %v1086_v63 = vsub.f32 1.5, %v1085_v60 }
 0xa1d   :  { %v1087_v0 = vmul.f32 %v2387_v13, %v1086_v63 }
 0xa1f   :  { %v1091_v2 = vsel %vm1090_vm7, %v2387_v13, %v1087_v0 }
 0xa20   :  { %v1102_v3 = vmul.f32 %v1091_v2, %v1068_v62 }
 0xa22   :  { %v1107_v4 = vmul.f32 %v2337_v1, %v1102_v3 }
 0xa24   :  { %2265 = vmatmul.msk.f32.vlgmr.msra.gmra.mxu0 %vm72_vm0, %v1107_v4 }
 0xa5a   :  { %v1065_v7 = vpop.xlane.xlu2 %1064 }
 0xa5b   :  { %v1067_v8 = vmul.f32 %v1065_v7, %v2593_v21 }
 0xa5d   :  { %v1069_v9 = vsub.f32 %v2833_v44, %v1067_v8 }
 0xa5f   :  { %v1071_v12 = vmul.f32 %v1069_v9, %v1069_v9 }
 0xa61   :  { %v1075_v15 = vsel %vm72_vm0, %v1071_v12, 0.0 }
 0xa62   :  { %1076 = vadd.xlane.f32.xlu2 %v1075_v15 }
 0xaa1   :  { %v2857_v16 = vpop.f32.mrf.mxu0 }
 0xaa2   :  { %1308 = vrot.lane.b32.xlu1 %v2857_v16, %s2461_s30  ;;  %1149 = vrot.lane.b32.xlu0 %v2857_v16, %s2462_s18 }
 0xaa3   :  { %1306 = vrot.lane.b32.xlu2 %v2857_v16, %s2463_s19 }
 0xad5   :  { %v1077_v17 = vpop.xlane.xlu2 %1076 }
 0xad6   :  { %v1079_v18 = vmul.f32 %v1077_v17, %v2593_v21 }
 0xad8   :  { %v1081_v19 = vadd.f32 1e-05, %v1079_v18 }
 0xada   :  { %2388 = vrsqrt.f32 %v1081_v19  ;;  %vm1098_vm10 = vweird.f32 %v1081_v19 }
 0xae0   :  { %v2389_v20 = vpop.eup %2388 }
 0xae1   :  { %v1093_v22 = vmul.f32 %v2389_v20, %v1081_v19  ;;  %vm1099_vm9 = vweird.f32 %v2389_v20 }
 0xae2   :  { %vm1100_vm11 = vmor %vm1098_vm10, %vm1099_vm9 }
 0xae3   :  { %v1094_v23 = vmul.f32 %v2389_v20, %v1093_v22 }
 0xae5   :  { %v1095_v24 = vmul.f32 0.5, %v1094_v23 }
 0xae7   :  { %v1096_v25 = vsub.f32 1.5, %v1095_v24 }
 0xae9   :  { %v1097_v26 = vmul.f32 %v2389_v20, %v1096_v25 }
 0xaeb   :  { %v1101_v27 = vsel %vm1100_vm11, %v2389_v20, %v1097_v26 }
 0xaec   :  { %v1103_v28 = vmul.f32 %v1101_v27, %v1069_v9 }
 0xaee   :  { %v1108_v29 = vmul.f32 %v2337_v1, %v1103_v28 }
 0xaf0   :  { %2266 = vmatmul.msk.f32.gmra.mxu0 %vm72_vm0, %v1108_v29 }
 0xafd   :  { %v1307_v31 = vpop.permute.xlu2 %1306 }
 0xb14   :  { %v1309_v30 = vpop.permute.xlu1 %1308  ;;  %v1150_v61 = vpop.permute.xlu0 %1149 }
 0xb15   :  { %2271 = vmatpush.xpose.msk.msrb.mxu3 %vm169_vm8, %v1150_v61 }
 0xb18   :  { %2272 = vmatmul.msk.f32.vlgmr.msrb.gmra.mxu3 %vm169_vm8, %v2857_v16 }
 0xb19   :  { %2277 = vmatpush.xpose.msk.msra.mxu3 %vm169_vm8, %v1309_v30 }
 0xb20   :  { %2278 = vmatmul.msk.f32.vlgmr.msra.gmra.mxu3 %vm169_vm8, %v1307_v31 }
 0xb6d   :  { %v2872_v32 = vpop.f32.mrf.mxu0 }
 0xb6e   :  { %1176 = vrot.lane.b32.xlu0 %v2872_v32, %s2462_s18 }
 0xb76   :  { %1414 = vrot.lane.b32.xlu0 %v2857_v16, %s2467_s23 }
 0xb9b   :  { %v1172_v33 = vpop.f32.mrf.mxu3 }
 0xb9c   :  { %v1202_v34 = vmul.f32 0.35355338, %v1172_v33 }
 0xb9e   :  { %v1204_v35 = vadd.f32 %v1202_v34, %v2649_v6 }
 0xba0   :  { %v1206_v36 = vsel %vm169_vm8, %v1204_v35, -inf }
 0xba1   :  { %1207 = vmax.xlane.f32.xlu1 %v1206_v36  ;;  %v2268_v36 = vld [vmem:[%s3103_s7 + $0x28] sm:$0xff] }
 0xba2   :  { %1487 = vmatpush.msrb.mxu3 %v2268_v36 }
 0xba3   :  { %v1331_v37 = vpop.f32.mrf.mxu3 }
 0xba4   :  { %v1362_v38 = vmul.f32 0.35355338, %v1331_v37 }
 0xba6   :  { %v1364_v39 = vadd.f32 %v1362_v38, %v2649_v6 }
 0xba8   :  { %v1366_v40 = vsel %vm169_vm8, %v1364_v39, -inf }
 0xba9   :  { %1367 = vmax.xlane.f32.xlu2 %v1366_v40 }
 0xbc1   :  { %1254 = vrot.lane.b32.xlu2 %v2857_v16, %s2464_s4 }
 0xbc9   :  { %1526 = vrot.lane.b32.xlu2 %v2857_v16, %s2465_s21 }
 0xbe0   :  { %v1177_v41 = vpop.permute.xlu0 %1176 }
 0xbe1   :  { %2273 = vmatpush.xpose.msk.msrb.mxu1 %vm169_vm8, %v1177_v41 }
 0xbe4   :  { %2274 = vmatmul.msk.f32.vlgmr.msrb.gmra.mxu1 %vm169_vm8, %v2872_v32 }
 0xbe8   :  { %v1415_v10 = vpop.permute.xlu0 %1414 }
 0xc14   :  { %v1208_v42 = vpop.xlane.xlu1 %1207 }
 0xc15   :  { %v1212_v45 = vsub.f32 %v1204_v35, %v1208_v42  ;;  %v2267_v35 = vld [vmem:[%s3103_s7 + $0x20] sm:$0xff] }
 0xc17   :  { %v1214_v46 = vmul.f32 1.442695, %v1212_v45 }
 0xc19   :  { %2390 = vpow2.f32 %v1214_v46 }
 0xc1c   :  { %v1368_v47 = vpop.xlane.xlu2 %1367 }
 0xc1d   :  { %v1372_v48 = vsub.f32 %v1364_v39, %v1368_v47 }
 0xc1f   :  { %v2391_v49 = vpop.eup %2390  ;;  %v1374_v62 = vmul.f32 1.442695, %v1372_v48 }
 0xc20   :  { %v1218_v5 = vsel %vm169_vm8, %v2391_v49, 0.0 }
 0xc21   :  { %2392 = vpow2.f32 %v1374_v62  ;;  %1219 = vadd.xlane.f32.xlu0 %v1218_v5 }
 0xc24   :  { %v1255_v50 = vpop.permute.xlu2 %1254 }
 0xc25   :  { %1275 = vmatpush.msrb.mxu2 %v1255_v50 }
 0xc27   :  { %1435 = vmatpush.msra.mxu2 %v1415_v10  ;;  %v2393_v51 = vpop.eup %2392 }
 0xc28   :  { %v1378_v52 = vsel %vm169_vm8, %v2393_v51, 0.0 }
 0xc29   :  { %1379 = vadd.xlane.f32.xlu1 %v1378_v52 }
 0xc2c   :  { %v1527_v18 = vpop.permute.xlu2 %1526 }
 0xc35   :  { %1334 = vrot.lane.b32.xlu0 %v2872_v32, %s2463_s19  ;;  %s3125_s19 = smov 104  }
 0xc3d   :  { %1524 = vrot.lane.b32.xlu0 %v2857_v16, %s2466_s22 }
 0xc42   :  { %1336 = vrot.lane.b32.xlu1 %v2872_v32, %s2461_s30 }
 0xc45   :  { %1280 = vrot.lane.b32.xlu0 %v2872_v32, %s2464_s4 }
 0xc61   :  { %v1199_v53 = vpop.f32.mrf.mxu1 }
 0xc62   :  { %v1203_v55 = vmul.f32 0.35355338, %v1199_v53 }
 0xc64   :  { %v1205_v54 = vadd.f32 %v1203_v55, %v2653_v14 }
 0xc66   :  { %v1209_v56 = vsel %vm169_vm8, %v1205_v54, -inf }
 0xc67   :  { %1210 = vmax.xlane.f32.xlu2 %v1209_v56 }
 0xc94   :  { %v1220_v57 = vpop.xlane.xlu0 %1219 }
 0xc95   :  { %2394 = vrcp.f32 %v1220_v57  ;;  %v1235_v60 = vand.u32 2147483648, %v1220_v57  ;;  %v1233_v0 = vand.u32 2147483647, %v1220_v57  ;;  %vm1229_vm13 = vweird.f32 %v1220_v57 }
 0xc97   :  { %v1236_v3 = vor.u32 1.1754944e-38, %v1235_v60  ;;  %vm1234_vm15 = vcmp.eq.f32.partialorder %v1233_v0, 8.507059e+37 }
 0xc9b   :  { %v2395_v11 = vpop.eup %2394 }
 0xc9c   :  { %v1225_v13 = vmul.f32 %v2395_v11, %v1220_v57  ;;  %v1380_v58 = vpop.xlane.xlu1 %1379  ;;  %vm1230_vm12 = vweird.f32 %v2395_v11 }
 0xc9d   :  { %2396 = vrcp.f32 %v1380_v58  ;;  %vm1231_vm14 = vmor %vm1229_vm13, %vm1230_vm12  ;;  %v1395_v15 = vand.u32 2147483648, %v1380_v58  ;;  %v1393_v20 = vand.u32 2147483647, %v1380_v58  ;;  %vm1389_vm3 = vweird.f32 %v1380_v58 }
 0xc9e   :  { %v1226_v59 = vsub.f32 1.0, %v1225_v13 }
 0xc9f   :  { %v1396_v23 = vor.u32 1.1754944e-38, %v1395_v15  ;;  %vm1394_vm5 = vcmp.eq.f32.partialorder %v1393_v20, 8.507059e+37 }
 0xca0   :  { %v1227_v63 = vmul.f32 %v2395_v11, %v1226_v59 }
 0xca2   :  { %v1228_v1 = vadd.f32 %v2395_v11, %v1227_v63 }
 0xca3   :  { %v2397_v2 = vpop.eup %2396 }
 0xca4   :  { %v1232_v4 = vsel %vm1231_vm14, %v2395_v11, %v1228_v1  ;;  %v1385_v7 = vmul.f32 %v2397_v2, %v1380_v58  ;;  %vm1390_vm2 = vweird.f32 %v2397_v2 }
 0xca5   :  { %v1237_v8 = vsel %vm1234_vm15, %v1236_v3, %v1232_v4  ;;  %vm1391_vm4 = vmor %vm1389_vm3, %vm1390_vm2 }
 0xca6   :  { %v1386_v9 = vsub.f32 1.0, %v1385_v7  ;;  %v1238_v12 = vmul.f32 %v2391_v49, %v1237_v8 }
 0xca7   :  { %v1335_v17 = vpop.permute.xlu0 %1334 }
 0xca8   :  { %v1387_v19 = vmul.f32 %v2397_v2, %v1386_v9  ;;  %2275 = vmatmul.msk.f32.vlgmr.msrb.gmra.mxu2 %vm169_vm8, %v1238_v12 }
 0xca9   :  { %2287 = vmatpush.xpose.msk.msrb.mxu2 %vm169_vm8, %v1527_v18 }
 0xcaa   :  { %v1388_v22 = vadd.f32 %v2397_v2, %v1387_v19 }
 0xcac   :  { %v1392_v24 = vsel %vm1391_vm4, %v2397_v2, %v1388_v22 }
 0xcad   :  { %v1397_v25 = vsel %vm1394_vm5, %v1396_v23, %v1392_v24 }
 0xcae   :  { %v1398_v26 = vmul.f32 %v2393_v51, %v1397_v25 }
 0xcaf   :  { %v1525_v27 = vpop.permute.xlu0 %1524 }
 0xcb0   :  { %2281 = vmatmul.msk.f32.vlgmr.msra.gmra.mxu2 %vm169_vm8, %v1398_v26 }
 0xcb4   :  { %v1337_v28 = vpop.permute.xlu1 %1336 }
 0xcb5   :  { %2279 = vmatpush.xpose.msk.msra.mxu1 %vm169_vm8, %v1337_v28 }
 0xcb7   :  { %v1281_v29 = vpop.permute.xlu0 %1280 }
 0xcb8   :  { %1301 = vmatpush.msrb.mxu0 %v1281_v29  ;;  %2280 = vmatmul.msk.f32.vlgmr.msra.gmra.mxu1 %vm169_vm8, %v1335_v17 }
 0xcb9   :  { %2288 = vmatmul.msk.f32.vlgmr.msrb.gmra.mxu2 %vm169_vm8, %v1525_v27  ;;  %1516 = vmatpush.msrb.mxu1 %v2267_v35 }
 0xcda   :  { %v1211_v30 = vpop.xlane.xlu2 %1210 }
 0xcdb   :  { %v1213_v61 = vsub.f32 %v1205_v54, %v1211_v30 }
 0xcdd   :  { %v1216_v31 = vmul.f32 1.442695, %v1213_v61 }
 0xcdf   :  { %2398 = vpow2.f32 %v1216_v31 }
 0xce5   :  { %v2399_v33 = vpop.eup %2398 }
 0xce6   :  { %v1221_v34 = vsel %vm169_vm8, %v2399_v33, 0.0 }
 0xce7   :  { %1222 = vadd.xlane.f32.xlu1 %v1221_v34 }
 0xd00   :  { %1440 = vrot.lane.b32.xlu1 %v2872_v32, %s2467_s23  ;;  %s2213_s23 = sshll.u32 %s3113_s17, 4  ;;  %s2214_s23 = int_to_ptr.hbm [resolvable:$true] %s2213_s23 }
 0xd08   :  { %1717 = vrot.lane.b32.xlu1 %v2857_v16, %s2468_s2 }
 0xd2b   :  { %v1277_v37 = vpop.f32.mrf.mxu2 }
 0xd2c   :  { %2285 = vmatmul.msk.f32.vlgmr.msrb.gmra.mxu1 %vm169_vm8, %v1277_v37 }
 0xd33   :  { %v1437_v38 = vpop.f32.mrf.mxu2 }
 0xd34   :  { %2283 = vmatmul.msk.f32.vlgmr.msrb.gmra.mxu3 %vm169_vm8, %v1437_v38 }
 0xd35   :  { %v1359_v39 = vpop.f32.mrf.mxu1 }
 0xd36   :  { %v1363_v40 = vmul.f32 0.35355338, %v1359_v39 }
 0xd38   :  { %v1365_v41 = vadd.f32 %v1363_v40, %v2653_v14 }
 0xd3a   :  { %v1369_v42 = vsel %vm169_vm8, %v1365_v41, -inf }
 0xd3b   :  { %1370 = vmax.xlane.f32.xlu0 %v1369_v42 }
 0xd3c   :  { %v1549_v45 = vpop.f32.mrf.mxu2 }
 0xd3d   :  { %v1580_v46 = vmul.f32 0.35355338, %v1549_v45 }
 0xd3f   :  { %v1582_v47 = vadd.f32 %v1580_v46, %v2649_v6 }
 0xd41   :  { %v1584_v48 = vsel %vm169_vm8, %v1582_v47, -inf }
 0xd42   :  { %1585 = vmax.xlane.f32.xlu2 %v1584_v48 }
 0xd4f   :  { %1554 = vrot.lane.b32.xlu0 %v2872_v32, %s2465_s21 }
 0xd57   :  { %1632 = vrot.lane.b32.xlu0 %v2857_v16, %s2470_s12 }
 0xd5a   :  { %1552 = vrot.lane.b32.xlu2 %v2872_v32, %s2466_s22  ;;  %v1223_v49 = vpop.xlane.xlu1 %1222  ;;  %s3126_s22 = smov 40  }
 0xd5b   :  { %2400 = vrcp.f32 %v1223_v49  ;;  %v1250_v10 = vand.u32 2147483648, %v1223_v49  ;;  %v1248_v52 = vand.u32 2147483647, %v1223_v49  ;;  %vm1244_vm7 = vweird.f32 %v1223_v49 }
 0xd5d   :  { %v1251_v55 = vor.u32 1.1754944e-38, %v1250_v10  ;;  %vm1249_vm10 = vcmp.eq.f32.partialorder %v1248_v52, 8.507059e+37  ;;  %v2269_v10 = vld [vmem:[%s3103_s7 + $0x30] sm:$0xff] }
 0xd5e   :  { %1705 = vmatpush.msra.mxu3 %v2269_v10 }
 0xd5f   :  { %1715 = vrot.lane.b32.xlu0 %v2857_v16, %s3125_s19 }
 0xd61   :  { %v2401_v62 = vpop.eup %2400 }
 0xd62   :  { %v1240_v5 = vmul.f32 %v2401_v62, %v1223_v49  ;;  %vm1245_vm6 = vweird.f32 %v2401_v62 }
 0xd63   :  { %vm1246_vm9 = vmor %vm1244_vm7, %vm1245_vm6 }
 0xd64   :  { %v1241_v50 = vsub.f32 1.0, %v1240_v5 }
 0xd66   :  { %v1242_v51 = vmul.f32 %v2401_v62, %v1241_v50 }
 0xd68   :  { %v1243_v53 = vadd.f32 %v2401_v62, %v1242_v51 }
 0xd6a   :  { %v1247_v54 = vsel %vm1246_vm9, %v2401_v62, %v1243_v53 }
 0xd6b   :  { %v1252_v56 = vsel %vm1249_vm10, %v1251_v55, %v1247_v54 }
 0xd6c   :  { %v1253_v57 = vmul.f32 %v2399_v33, %v1252_v56 }
 0xd6e   :  { %2276 = vmatmul.msk.f32.vlgmr.msrb.gmra.mxu0 %vm169_vm8, %v1253_v57 }
 0xd72   :  { %v1441_v11 = vpop.permute.xlu1 %1440 }
 0xd73   :  { %1461 = vmatpush.msra.mxu0 %v1441_v11 }
 0xd7a   :  { %v1718_v13 = vpop.permute.xlu1 %1717 }
 0xd7b   :  { %2295 = vmatpush.xpose.msk.msra.mxu1 %vm169_vm8, %v1718_v13 }
 0xdae   :  { %v1371_v58 = vpop.xlane.xlu0 %1370 }
 0xdaf   :  { %v1373_v59 = vsub.f32 %v1365_v41, %v1371_v58 }
 0xdb1   :  { %v1376_v60 = vmul.f32 1.442695, %v1373_v59 }
 0xdb3   :  { %2402 = vpow2.f32 %v1376_v60 }
 0xdb5   :  { %v1586_v63 = vpop.xlane.xlu2 %1585 }
 0xdb6   :  { %v1590_v0 = vsub.f32 %v1582_v47, %v1586_v63  ;;  %v2948_v47 = vpop.f32.mrf.mxu1 }
 0xdb8   :  { %v1592_v1 = vmul.f32 1.442695, %v1590_v0 }
 0xdb9   :  { %v2403_v2 = vpop.eup %2402 }
 0xdba   :  { %2404 = vpow2.f32 %v1592_v1  ;;  %v1381_v3 = vsel %vm169_vm8, %v2403_v2, 0.0 }
 0xdbb   :  { %1382 = vadd.xlane.f32.xlu1 %v1381_v3 }
 0xdbd   :  { %v1553_v17 = vpop.permute.xlu2 %1552 }
 0xdc0   :  { %v2405_v4 = vpop.eup %2404 }
 0xdc1   :  { %v1555_v7 = vpop.permute.xlu0 %1554  ;;  %v1596_v8 = vsel %vm169_vm8, %v2405_v4, 0.0 }
 0xdc2   :  { %1597 = vadd.xlane.f32.xlu2 %v1596_v8  ;;  %2289 = vmatpush.xpose.msk.msrb.mxu0 %vm169_vm8, %v1555_v7 }
 0xdc9   :  { %v1633_v9 = vpop.permute.xlu0 %1632 }
 0xdca   :  { %1653 = vmatpush.msra.mxu2 %v1633_v9 }
 0xdd1   :  { %v1716_v15 = vpop.permute.xlu0 %1715 }
 0xdd4   :  { %1743 = vrot.lane.b32.xlu1 %v2872_v32, %s3125_s19 }
 0xdda   :  { %1745 = vrot.lane.b32.xlu2 %v2872_v32, %s2468_s2 }
 0xdeb   :  { %v1303_v12 = vpop.f32.mrf.mxu0 }
 0xdec   :  { %2286 = vmatmul.msk.f32.gmra.mxu1 %vm169_vm8, %v1303_v12 }
 0xdf4   :  { %2296 = vmatmul.msk.f32.vlgmr.msra.gmra.mxu1 %vm169_vm8, %v1716_v15 }
 0xe2e   :  { %v1383_v18 = vpop.xlane.xlu1 %1382 }
 0xe2f   :  { %2406 = vrcp.f32 %v1383_v18  ;;  %v1410_v24 = vand.u32 2147483648, %v1383_v18  ;;  %v1408_v26 = vand.u32 2147483647, %v1383_v18  ;;  %vm1404_vm12 = vweird.f32 %v1383_v18 }
 0xe31   :  { %v1411_v29 = vor.u32 1.1754944e-38, %v1410_v24  ;;  %vm1409_vm14 = vcmp.eq.f32.partialorder %v1408_v26, 8.507059e+37 }
 0xe35   :  { %v2407_v19 = vpop.eup %2406  ;;  %v1598_v20 = vpop.xlane.xlu2 %1597 }
 0xe36   :  { %v1400_v22 = vmul.f32 %v2407_v19, %v1383_v18  ;;  %2408 = vrcp.f32 %v1598_v20  ;;  %vm1405_vm11 = vweird.f32 %v2407_v19  ;;  %v1613_v35 = vand.u32 2147483648, %v1598_v20 }
 0xe37   :  { %vm1406_vm13 = vmor %vm1404_vm12, %vm1405_vm11  ;;  %v1611_v38 = vand.u32 2147483647, %v1598_v20  ;;  %vm1607_vm2 = vweird.f32 %v1598_v20 }
 0xe38   :  { %v1401_v23 = vsub.f32 1.0, %v1400_v22  ;;  %v1614_v40 = vor.u32 1.1754944e-38, %v1613_v35 }
 0xe39   :  { %vm1612_vm4 = vcmp.eq.f32.partialorder %v1611_v38, 8.507059e+37 }
 0xe3a   :  { %v1402_v25 = vmul.f32 %v2407_v19, %v1401_v23 }
 0xe3c   :  { %v2409_v27 = vpop.eup %2408  ;;  %v1403_v28 = vadd.f32 %v2407_v19, %v1402_v25 }
 0xe3d   :  { %v1603_v30 = vmul.f32 %v2409_v27, %v1598_v20  ;;  %v1746_v61 = vpop.permute.xlu2 %1745  ;;  %vm1608_vm15 = vweird.f32 %v2409_v27 }
 0xe3e   :  { %v1407_v31 = vsel %vm1406_vm13, %v2407_v19, %v1403_v28  ;;  %2297 = vmatpush.xpose.msk.msrb.mxu2 %vm169_vm8, %v1746_v61  ;;  %vm1609_vm3 = vmor %vm1607_vm2, %vm1608_vm15 }
 0xe3f   :  { %v1412_v33 = vsel %vm1409_vm14, %v1411_v29, %v1407_v31  ;;  %v1604_v34 = vsub.f32 1.0, %v1603_v30 }
 0xe40   :  { %v1413_v36 = vmul.f32 %v2403_v2, %v1412_v33 }
 0xe41   :  { %v1605_v37 = vmul.f32 %v2409_v27, %v1604_v34 }
 0xe42   :  { %2282 = vmatmul.msk.f32.vlgmr.msra.gmra.mxu0 %vm169_vm8, %v1413_v36 }
 0xe43   :  { %v1606_v39 = vadd.f32 %v2409_v27, %v1605_v37 }
 0xe45   :  { %v1610_v41 = vsel %vm1609_vm3, %v2409_v27, %v1606_v39 }
 0xe46   :  { %v1615_v42 = vsel %vm1612_vm4, %v1614_v40, %v1610_v41  ;;  %v1744_v46 = vpop.permute.xlu1 %1743 }
 0xe47   :  { %v1616_v45 = vmul.f32 %v2405_v4, %v1615_v42 }
 0xe49   :  { %2291 = vmatmul.msk.f32.vlgmr.msra.gmra.mxu2 %vm169_vm8, %v1616_v45 }
 0xe4a   :  { %2290 = vmatmul.msk.f32.vlgmr.msrb.gmra.mxu0 %vm169_vm8, %v1553_v17 }
 0xe51   :  { %2298 = vmatmul.msk.f32.vlgmr.msrb.gmra.mxu2 %vm169_vm8, %v1744_v46 }
 0xe69   :  { %v2950_v48 = vpop.f32.mrf.mxu1 }
 0xe71   :  { %v1740_v49 = vpop.f32.mrf.mxu1 }
 0xe72   :  { %v1771_v62 = vmul.f32 0.35355338, %v1740_v49 }
 0xe74   :  { %v1773_v5 = vadd.f32 %v1771_v62, %v2649_v6 }
 0xe76   :  { %v1775_v50 = vsel %vm169_vm8, %v1773_v5, -inf }
 0xe77   :  { %1776 = vmax.xlane.f32.xlu0 %v1775_v50 }
 0xebf   :  { %v1463_v51 = vpop.f32.mrf.mxu0 }
 0xec0   :  { %2284 = vmatmul.msk.f32.gmra.mxu3 %vm169_vm8, %v1463_v51 }
 0xec7   :  { %v1577_v52 = vpop.f32.mrf.mxu0 }
 0xec8   :  { %v1581_v53 = vmul.f32 0.35355338, %v1577_v52 }
 0xeca   :  { %v1583_v55 = vadd.f32 %v1581_v53, %v2653_v14 }
 0xecc   :  { %v1655_v54 = vpop.f32.mrf.mxu2  ;;  %v1587_v56 = vsel %vm169_vm8, %v1583_v55, -inf }
 0xecd   :  { %2293 = vmatmul.msk.f32.vlgmr.msra.gmra.mxu3 %vm169_vm8, %v1655_v54  ;;  %1588 = vmax.xlane.f32.xlu2 %v1587_v56  ;;  %v2270_v56 = vld [vmem:[%s3103_s7 + $0x38] sm:$0xff] }
 0xece   :  { %1896 = vmatpush.msra.mxu2 %v2270_v56 }
 0xed4   :  { %v1768_v6 = vpop.f32.mrf.mxu2 }
 0xed5   :  { %v1772_v57 = vmul.f32 0.35355338, %v1768_v6 }
 0xed7   :  { %v1774_v11 = vadd.f32 %v1772_v57, %v2653_v14 }
 0xed9   :  { %v1778_v13 = vsel %vm169_vm8, %v1774_v11, -inf }
 0xeda   :  { %1779 = vmax.xlane.f32.xlu1 %v1778_v13  ;;  %v1489_v13 = vpop.f32.mrf.mxu3 }
 0xeea   :  { %v1777_v58 = vpop.xlane.xlu0 %1776 }
 0xeeb   :  { %v1781_v59 = vsub.f32 %v1773_v5, %v1777_v58 }
 0xeed   :  { %v1783_v60 = vmul.f32 1.442695, %v1781_v59 }
 0xeef   :  { %2410 = vpow2.f32 %v1783_v60  ;;  %v1519_v60 = vadd.f32 %v2948_v47, %v1489_v13 }
 0xef5   :  { %v2963_v63 = vpop.eup %2410 }
 0xef6   :  { %v1787_v0 = vsel %vm169_vm8, %v2963_v63, 0.0 }
 0xef7   :  { %1788 = vadd.xlane.f32.xlu0 %v1787_v0 }
 0xf0b   :  { %1823 = vrot.lane.b32.xlu0 %v2857_v16, %s3126_s22 }
 0xf40   :  { %v1589_v1 = vpop.xlane.xlu2 %1588 }
 0xf41   :  { %v1591_v2 = vsub.f32 %v1583_v55, %v1589_v1 }
 0xf43   :  { %v1594_v3 = vmul.f32 1.442695, %v1591_v2  ;;  %v1492_v58 = vpop.f32.mrf.mxu3 }
 0xf45   :  { %2412 = vpow2.f32 %v1594_v3 }
 0xf4b   :  { %v2413_v14 = vpop.eup %2412 }
 0xf4c   :  { %v1599_v4 = vsel %vm169_vm8, %v2413_v14, 0.0 }
 0xf4d   :  { %v1780_v7 = vpop.xlane.xlu1 %1779  ;;  %1600 = vadd.xlane.f32.xlu2 %v1599_v4  ;;  %v1522_v4 = vadd.f32 %v2950_v48, %v1492_v58 }
 0xf4e   :  { %v1782_v8 = vsub.f32 %v1774_v11, %v1780_v7 }
 0xf50   :  { %v1785_v9 = vmul.f32 1.442695, %v1782_v8  ;;  %v1707_v59 = vpop.f32.mrf.mxu3 }
 0xf52   :  { %2414 = vpow2.f32 %v1785_v9 }
 0xf58   :  { %v2415_v12 = vpop.eup %2414 }
 0xf59   :  { %v1790_v15 = vsel %vm169_vm8, %v2415_v12, 0.0 }
 0xf5a   :  { %1791 = vadd.xlane.f32.xlu1 %v1790_v15 }
 0xf65   :  { %1658 = vrot.lane.b32.xlu2 %v2872_v32, %s2470_s12 }
 0xf6a   :  { %v1789_v16 = vpop.xlane.xlu0 %1788 }
 0xf6b   :  { %2416 = vrcp.f32 %v1789_v16  ;;  %v1804_v35 = vand.u32 2147483648, %v1789_v16  ;;  %vm1798_vm11 = vweird.f32 %v1789_v16  ;;  %v1802_v37 = vand.u32 2147483647, %v1789_v16 }
 0xf6d   :  { %v1805_v41 = vor.u32 1.1754944e-38, %v1804_v35  ;;  %vm1803_vm13 = vcmp.eq.f32.partialorder %v1802_v37, 8.507059e+37  ;;  %v2313_v37 = vld [vmem:[%s3106_s10 + $0x58] sm:$0xff] }
 0xf71   :  { %v2417_v18 = vpop.eup %2416 }
 0xf72   :  { %v1794_v19 = vmul.f32 %v2417_v18, %v1789_v16  ;;  %vm1799_vm9 = vweird.f32 %v2417_v18 }
 0xf73   :  { %1849 = vrot.lane.b32.xlu1 %v2872_v32, %s3126_s22  ;;  %vm1800_vm12 = vmor %vm1798_vm11, %vm1799_vm9 }
 0xf74   :  { %v1795_v22 = vsub.f32 1.0, %v1794_v19 }
 0xf76   :  { %v1796_v28 = vmul.f32 %v2417_v18, %v1795_v22 }
 0xf78   :  { %v1797_v33 = vadd.f32 %v2417_v18, %v1796_v28 }
 0xf7a   :  { %v1801_v40 = vsel %vm1800_vm12, %v2417_v18, %v1797_v33 }
 0xf7b   :  { %v1806_v45 = vsel %vm1803_vm13, %v1805_v41, %v1801_v40  ;;  %v2312_v40 = vld [vmem:[%s3106_s10 + $0x50] sm:$0xff] }
 0xf7c   :  { %v1807_v62 = vmul.f32 %v2963_v63, %v1806_v45  ;;  %v1713_v63 = vadd.f32 %v1707_v59, %v1519_v60 }
 0xf7d   :  { %v1824_v25 = vpop.permute.xlu0 %1823 }
 0xfc0   :  { %v1601_v17 = vpop.xlane.xlu2 %1600 }
 0xfc1   :  { %2418 = vrcp.f32 %v1601_v17  ;;  %v1628_v27 = vand.u32 2147483648, %v1601_v17  ;;  %v1626_v30 = vand.u32 2147483647, %v1601_v17  ;;  %vm1622_vm6 = vweird.f32 %v1601_v17 }
 0xfc3   :  { %v1629_v31 = vor.u32 1.1754944e-38, %v1628_v27  ;;  %vm1627_vm10 = vcmp.eq.f32.partialorder %v1626_v30, 8.507059e+37  ;;  %v2317_v30 = vld [vmem:[%s3106_s10 + $0x78] sm:$0xff] }
 0xfc4   :  { %2018 = vmatpush.msrb.mxu3 %v2317_v30 }
 0xfc7   :  { %v2419_v20 = vpop.eup %2418 }
 0xfc8   :  { %v1618_v23 = vmul.f32 %v2419_v20, %v1601_v17  ;;  %v1659_v24 = vpop.permute.xlu2 %1658  ;;  %vm1623_vm5 = vweird.f32 %v2419_v20 }
 0xfc9   :  { %1679 = vmatpush.msra.mxu0 %v1659_v24  ;;  %vm1624_vm7 = vmor %vm1622_vm6, %vm1623_vm5  ;;  %v2306_v24 = vld [vmem:[%s3105_s9 + $0x30] sm:$0xff] }
 0xfca   :  { %v1619_v26 = vsub.f32 1.0, %v1618_v23  ;;  %v2307_v23 = vld [vmem:[%s3105_s9 + $0x38] sm:$0xff] }
 0xfcb   :  { %1844 = vmatpush.msrb.mxu0 %v1824_v25  ;;  %v2305_v25 = vld [vmem:[%s3105_s9 + $0x28] sm:$0xff] }
 0xfcc   :  { %v1620_v29 = vmul.f32 %v2419_v20, %v1619_v26  ;;  %v2304_v26 = vld [vmem:[%s3105_s9 + $0x20] sm:$0xff] }
 0xfcd   :  { %v1792_v32 = vpop.xlane.xlu1 %1791 }
 0xfce   :  { %v1621_v61 = vadd.f32 %v2419_v20, %v1620_v29  ;;  %2420 = vrcp.f32 %v1792_v32  ;;  %v1819_v50 = vand.u32 2147483648, %v1792_v32  ;;  %vm1813_vm15 = vweird.f32 %v1792_v32 }
 0xfcf   :  { %v1817_v10 = vand.u32 2147483647, %v1792_v32 }
 0xfd0   :  { %v1625_v34 = vsel %vm1624_vm7, %v2419_v20, %v1621_v61  ;;  %v1820_v52 = vor.u32 1.1754944e-38, %v1819_v50  ;;  %v2315_v61 = vld [vmem:[%s3106_s10 + $0x68] sm:$0xff] }
 0xfd1   :  { %v1630_v36 = vsel %vm1627_vm10, %v1629_v31, %v1625_v34  ;;  %vm1818_vm3 = vcmp.eq.f32.partialorder %v1817_v10, 8.507059e+37  ;;  %v2314_v31 = vld [vmem:[%s3106_s10 + $0x60] sm:$0xff] }
 0xfd2   :  { %v1631_v38 = vmul.f32 %v2413_v14, %v1630_v36 }
 0xfd4   :  { %v2421_v39 = vpop.eup %2420  ;;  %2292 = vmatmul.msk.f32.vlgmr.msra.gmra.mxu0 %vm169_vm8, %v1631_v38 }
 0xfd5   :  { %v1809_v42 = vmul.f32 %v2421_v39, %v1792_v32  ;;  %vm1814_vm14 = vweird.f32 %v2421_v39  ;;  %1982 = vmatpush.msra.mxu0 %v2307_v23  ;;  %v2316_v32 = vld [vmem:[%s3106_s10 + $0x70] sm:$0xff] }
 0xfd6   :  { %vm1815_vm2 = vmor %vm1813_vm15, %vm1814_vm14  ;;  %2019 = vmatpush.msrb.mxu3 %v2316_v32 }
 0xfd7   :  { %v1810_v46 = vsub.f32 1.0, %v1809_v42  ;;  %1983 = vmatpush.msra.mxu0 %v2306_v24 }
 0xfd8   :  { %2020 = vmatpush.msrb.mxu3 %v2315_v61  ;;  %v2340_v61 = vld [vmem:[%s3127_s25] ss:$0 sm:$0xff] }
 0xfd9   :  { %v1811_v49 = vmul.f32 %v2421_v39, %v1810_v46  ;;  %1984 = vmatpush.msra.mxu0 %v2305_v25  ;;  %v2338_v46 = vld [vmem:[%s3104_s8 + $0x1] ss:$0 sm:$0xff] }
 0xfda   :  { %2021 = vmatpush.msrb.mxu3 %v2314_v31 }
 0xfdb   :  { %v1812_v5 = vadd.f32 %v2421_v39, %v1811_v49  ;;  %1985 = vmatpush.msra.mxu0 %v2304_v26 }
 0xfdc   :  { %2299 = vmatmul.msk.f32.vlgmr.msrb.gmra.mxu0 %vm169_vm8, %v1807_v62  ;;  %2022 = vmatpush.msrb.mxu3 %v2313_v37 }
 0xfdd   :  { %v1816_v51 = vsel %vm1815_vm2, %v2421_v39, %v1812_v5  ;;  %vm2118_vm2 = vcmask 1041409  }
 0xfde   :  { %v1821_v53 = vsel %vm1818_vm3, %v1820_v52, %v1816_v51  ;;  %2023 = vmatpush.msrb.mxu3 %v2312_v40  ;;  %vm2121_vm3 = vcmask 254976  }
 0xfdf   :  { %v1822_v54 = vmul.f32 %v2415_v12, %v1821_v53 }
 0xfe5   :  { %v1850_v55 = vpop.permute.xlu1 %1849 }
 0xfe6   :  { %1870 = vmatpush.msrb.mxu1 %v1850_v55 }
 0xfe7   :  { %2300 = vmatmul.msk.f32.vlgmr.msrb.gmra.mxu1 %vm169_vm8, %v1822_v54 }
0x1051   :  { %v1681_v6 = vpop.f32.mrf.mxu0 }
0x1052   :  { %2294 = vmatmul.msk.f32.gmra.mxu3 %vm169_vm8, %v1681_v6 }
0x1059   :  { %v1846_v57 = vpop.f32.mrf.mxu0 }
0x105a   :  { %2301 = vmatmul.msk.f32.vlgmr.msra.gmra.mxu2 %vm169_vm8, %v1846_v57  ;;  %v2311_v57 = vld [vmem:[%s3106_s10 + $0x48] sm:$0xff] }
0x105b   :  { %2024 = vmatpush.msrb.mxu3 %v2311_v57 }
0x1064   :  { %v1872_v11 = vpop.f32.mrf.mxu1 }
0x1065   :  { %2302 = vmatmul.msk.f32.gmra.mxu2 %vm169_vm8, %v1872_v11  ;;  %v2310_v11 = vld [vmem:[%s3106_s10 + $0x40] sm:$0xff] }
0x1066   :  { %2025 = vmatpush.msrb.mxu3 %v2310_v11 }
0x10d5   :  { %v1710_v14 = vpop.f32.mrf.mxu3 }
0x10d6   :  { %v1714_v7 = vadd.f32 %v1710_v14, %v1522_v4 }
0x10dd   :  { %v1898_v0 = vpop.f32.mrf.mxu2 }
0x10de   :  { %v1904_v1 = vadd.f32 %v1898_v0, %v1713_v63 }
0x10e0   :  { %v2987_v2 = vadd.f32 %v1904_v1, %v2824_v43 }
0x10e2   :  { %v1910_v3 = vsel %vm72_vm0, %v2987_v2, 0.0 }
0x10e3   :  { %1911 = vadd.xlane.f32.xlu0 %v1910_v3 }
0x10e8   :  { %v1901_v8 = vpop.f32.mrf.mxu2 }
0x10e9   :  { %v1905_v9 = vadd.f32 %v1901_v8, %v1714_v7 }
0x10eb   :  { %v2993_v12 = vadd.f32 %v1905_v9, %v2833_v44 }
0x10ed   :  { %v1913_v47 = vsel %vm72_vm0, %v2993_v12, 0.0 }
0x10ee   :  { %1914 = vadd.xlane.f32.xlu2 %v1913_v47 }
0x1156   :  { %v1912_v15 = vpop.xlane.xlu0 %1911 }
0x1157   :  { %v1916_v43 = vmul.f32 %v1912_v15, %v2593_v21 }
0x1159   :  { %v1918_v16 = vsub.f32 %v2987_v2, %v1916_v43 }
0x115b   :  { %v1920_v17 = vmul.f32 %v1918_v16, %v1918_v16 }
0x115d   :  { %v1922_v18 = vsel %vm72_vm0, %v1920_v17, 0.0 }
0x115e   :  { %1923 = vadd.xlane.f32.xlu1 %v1922_v18 }
0x1161   :  { %v1915_v48 = vpop.xlane.xlu2 %1914 }
0x1162   :  { %v1917_v19 = vmul.f32 %v1915_v48, %v2593_v21 }
0x1164   :  { %v1919_v20 = vsub.f32 %v2993_v12, %v1917_v19 }
0x1166   :  { %v1921_v44 = vmul.f32 %v1919_v20, %v1919_v20 }
0x1168   :  { %v1925_v22 = vsel %vm72_vm0, %v1921_v44, 0.0 }
0x1169   :  { %1926 = vadd.xlane.f32.xlu2 %v1925_v22 }
0x11d1   :  { %v1924_v27 = vpop.xlane.xlu1 %1923 }
0x11d2   :  { %v1928_v28 = vmul.f32 %v1924_v27, %v2593_v21 }
0x11d4   :  { %v1930_v29 = vadd.f32 1e-05, %v1928_v28 }
0x11d6   :  { %2422 = vrsqrt.f32 %v1930_v29  ;;  %vm1938_vm4 = vweird.f32 %v1930_v29 }
0x11dc   :  { %v2423_v33 = vpop.eup %2422  ;;  %v1927_v34 = vpop.xlane.xlu2 %1926 }
0x11dd   :  { %v1933_v35 = vmul.f32 %v2423_v33, %v1930_v29  ;;  %v1929_v36 = vmul.f32 %v1927_v34, %v2593_v21  ;;  %vm1939_vm8 = vweird.f32 %v2423_v33  ;;  %v2339_v29 = vld [vmem:[%s3107_s11] ss:$0 sm:$0xff] }
0x11de   :  { %vm1940_vm5 = vmor %vm1938_vm4, %vm1939_vm8 }
0x11df   :  { %v1934_v38 = vmul.f32 %v2423_v33, %v1933_v35  ;;  %v1931_v39 = vadd.f32 1e-05, %v1929_v36  ;;  %v2472_v36 = vmov 8.0  }
0x11e1   :  { %v1935_v41 = vmul.f32 0.5, %v1934_v38  ;;  %2424 = vrsqrt.f32 %v1931_v39  ;;  %vm1948_vm7 = vweird.f32 %v1931_v39 }
0x11e3   :  { %v1936_v42 = vsub.f32 1.5, %v1935_v41 }
0x11e5   :  { %v1937_v45 = vmul.f32 %v2423_v33, %v1936_v42 }
0x11e7   :  { %v2425_v49 = vpop.eup %2424  ;;  %v1941_v62 = vsel %vm1940_vm5, %v2423_v33, %v1937_v45 }
0x11e8   :  { %v1952_v5 = vmul.f32 %v1941_v62, %v1918_v16  ;;  %v1943_v50 = vmul.f32 %v2425_v49, %v1931_v39  ;;  %vm1949_vm6 = vweird.f32 %v2425_v49 }
0x11e9   :  { %vm1950_vm9 = vmor %vm1948_vm7, %vm1949_vm6  ;;  %vm2204_vm6 = vcmask 25600  }
0x11ea   :  { %v1957_v10 = vmul.f32 %v2338_v46, %v1952_v5  ;;  %v1944_v51 = vmul.f32 %v2425_v49, %v1943_v50 }
0x11ec   :  { %v1945_v52 = vmul.f32 0.5, %v1944_v51  ;;  %2308 = vmatmul.msk.f32.vlgmr.msra.gmra.mxu0 %vm72_vm0, %v1957_v10 }
0x11ee   :  { %v1946_v53 = vsub.f32 1.5, %v1945_v52 }
0x11f0   :  { %v1947_v55 = vmul.f32 %v2425_v49, %v1946_v53 }
0x11f2   :  { %v1951_v54 = vsel %vm1950_vm9, %v2425_v49, %v1947_v55 }
0x11f3   :  { %v1953_v56 = vmul.f32 %v1951_v54, %v1919_v20 }
0x11f5   :  { %v1958_v6 = vmul.f32 %v2338_v46, %v1953_v56 }
0x11f7   :  { %2309 = vmatmul.msk.f32.gmra.mxu0 %vm72_vm0, %v1958_v6 }
0x1269   :  { %v1987_v13 = vpop.f32.mrf.mxu0 }
0x126a   :  { %v1993_v58 = vmax.f32 %v1987_v13, 0.0 }
0x126c   :  { %2318 = vmatmul.msk.f32.vlgmr.msrb.gmra.mxu3 %vm1026_vm1, %v1993_v58 }
0x1274   :  { %v1990_v59 = vpop.f32.mrf.mxu0 }
0x1275   :  { %v1994_v60 = vmax.f32 %v1990_v59, 0.0 }
0x1277   :  { %2319 = vmatmul.msk.f32.gmra.mxu3 %vm1026_vm1, %v1994_v60 }
0x12ef   :  { %v2027_v63 = vpop.f32.mrf.mxu3 }
0x12f0   :  { %v2033_v0 = vadd.f32 %v2027_v63, %v2987_v2 }
0x12f2   :  { %v2037_v1 = vsel %vm72_vm0, %v2033_v0, 0.0 }
0x12f3   :  { %2038 = vadd.xlane.f32.xlu0 %v2037_v1 }
0x12fa   :  { %v2030_v3 = vpop.f32.mrf.mxu3 }
0x12fb   :  { %v2034_v14 = vadd.f32 %v2030_v3, %v2993_v12 }
0x12fd   :  { %v2040_v4 = vsel %vm72_vm0, %v2034_v14, 0.0 }
0x12fe   :  { %2041 = vadd.xlane.f32.xlu1 %v2040_v4 }
0x1366   :  { %v2039_v7 = vpop.xlane.xlu0 %2038 }
0x1367   :  { %v2043_v8 = vmul.f32 %v2039_v7, %v2593_v21 }
0x1369   :  { %v2045_v9 = vsub.f32 %v2033_v0, %v2043_v8 }
0x136b   :  { %v2047_v47 = vmul.f32 %v2045_v9, %v2045_v9 }
0x136d   :  { %v2049_v15 = vsel %vm72_vm0, %v2047_v47, 0.0 }
0x136e   :  { %2050 = vadd.xlane.f32.xlu2 %v2049_v15 }
0x1371   :  { %v2042_v43 = vpop.xlane.xlu1 %2041 }
0x1372   :  { %v2044_v2 = vmul.f32 %v2042_v43, %v2593_v21 }
0x1374   :  { %v2046_v16 = vsub.f32 %v2034_v14, %v2044_v2 }
0x1376   :  { %v2048_v17 = vmul.f32 %v2046_v16, %v2046_v16 }
0x1378   :  { %v2052_v18 = vsel %vm72_vm0, %v2048_v17, 0.0 }
0x1379   :  { %2053 = vadd.xlane.f32.xlu0 %v2052_v18 }
0x13e1   :  { %v2051_v12 = vpop.xlane.xlu2 %2050 }
0x13e2   :  { %v2055_v48 = vmul.f32 %v2051_v12, %v2593_v21  ;;  %v2173_v12 = vld [vmem:[%s3111_s15 + $0x18] sm:$0xff] }
0x13e3   :  { %2196 = vmatpush.msra.mxu1 %v2173_v12 }
0x13e4   :  { %v2057_v19 = vadd.f32 1e-05, %v2055_v48  ;;  %v2172_v48 = vld [vmem:[%s3111_s15 + $0x10] sm:$0xff] }
0x13e5   :  { %2197 = vmatpush.msra.mxu1 %v2172_v48 }
0x13e6   :  { %2426 = vrsqrt.f32 %v2057_v19  ;;  %vm2065_vm10 = vweird.f32 %v2057_v19 }
0x13ec   :  { %v2427_v20 = vpop.eup %2426  ;;  %v2054_v44 = vpop.xlane.xlu0 %2053 }
0x13ed   :  { %v2060_v22 = vmul.f32 %v2427_v20, %v2057_v19  ;;  %v2056_v23 = vmul.f32 %v2054_v44, %v2593_v21  ;;  %vm2066_vm1 = vweird.f32 %v2427_v20  ;;  %v2171_v19 = vld [vmem:[%s3111_s15 + $0x8] sm:$0xff] }
0x13ee   :  { %vm2067_vm11 = vmor %vm2065_vm10, %vm2066_vm1  ;;  %2198 = vmatpush.msra.mxu1 %v2171_v19 }
0x13ef   :  { %v2061_v24 = vmul.f32 %v2427_v20, %v2060_v22  ;;  %v2058_v25 = vadd.f32 1e-05, %v2056_v23 }
0x13f1   :  { %v2062_v26 = vmul.f32 0.5, %v2061_v24  ;;  %2428 = vrsqrt.f32 %v2058_v25  ;;  %vm2075_vm13 = vweird.f32 %v2058_v25 }
0x13f2   :  { %2430 = vrcp.f32 %v2472_v36 }
0x13f3   :  { %v2063_v27 = vsub.f32 1.5, %v2062_v26 }
0x13f5   :  { %v2064_v28 = vmul.f32 %v2427_v20, %v2063_v27 }
0x13f7   :  { %v2429_v30 = vpop.eup %2428  ;;  %v2068_v32 = vsel %vm2067_vm11, %v2427_v20, %v2064_v28  ;;  %v2170_v20 = vld [vmem:[%s3111_s15] sm:$0xff] }
0x13f8   :  { %v2079_v31 = vmul.f32 %v2068_v32, %v2045_v9  ;;  %v2070_v33 = vmul.f32 %v2429_v30, %v2058_v25  ;;  %vm2076_vm12 = vweird.f32 %v2429_v30  ;;  %v2431_v42 = vpop.eup %2430  ;;  %2199 = vmatpush.msra.mxu1 %v2170_v20  ;;  %v2341_v32 = vld [vmem:[%s3109_s13] ss:$0 sm:$0xff]  ;;  %s2473_s13 = smov [#allocation2]  }
0x13f9   :  { %vm2077_vm14 = vmor %vm2075_vm13, %vm2076_vm12  ;;  %v2106_v5 = vmul.f32 8.0, %v2431_v42  ;;  %vm2110_vm15 = vweird.f32 %v2431_v42  ;;  %s2211_s4 = sshll.u32 %s2473_s13, 4  ;;  %s2212_s4 = int_to_ptr.vmem [resolvable:$true] %s2211_s4 }
0x13fa   :  { %v2084_v34 = vmul.f32 %v2339_v29, %v2079_v31  ;;  %v2071_v35 = vmul.f32 %v2429_v30, %v2070_v33 }
0x13fb   :  { %v2107_v52 = vsub.f32 1.0, %v2106_v5 }
0x13fc   :  { %v2089_v37 = vadd.f32 %v2340_v61, %v2084_v34  ;;  %v2072_v38 = vmul.f32 0.5, %v2071_v35  ;;  %v2342_v35 = vld [vmem:[%s3110_s14] ss:$0 sm:$0xff] }
0x13fd   :  { %v2108_v56 = vmul.f32 %v2431_v42, %v2107_v52 }
0x13fe   :  { %v2073_v39 = vsub.f32 1.5, %v2072_v38  ;;  %v2091_v40 = vsel %vm72_vm0, %v2089_v37, 0.0 }
0x13ff   :  { %v2092_v41 = vrot.slane %v2091_v40, 4  ;;  %v2109_v13 = vadd.f32 %v2431_v42, %v2108_v56 }
0x1400   :  { %v2074_v45 = vmul.f32 %v2429_v30, %v2073_v39 }
0x1401   :  { %v2093_v49 = vadd.f32 %v2092_v41, %v2091_v40  ;;  %v2111_v63 = vsel %vm2110_vm15, %v2431_v42, %v2109_v13  ;;  %v2343_v40 = vld [vmem:[%s3112_s16] ss:$0 sm:$0xff] }
0x1402   :  { %v2078_v46 = vsel %vm2077_vm14, %v2429_v30, %v2074_v45 }
0x1403   :  { %v2080_v62 = vmul.f32 %v2078_v46, %v2046_v16  ;;  %v2094_v10 = vrot.slane %v2093_v49, 2 }
0x1405   :  { %v2085_v50 = vmul.f32 %v2339_v29, %v2080_v62  ;;  %v2095_v55 = vadd.f32 %v2094_v10, %v2093_v49 }
0x1407   :  { %v2090_v51 = vadd.f32 %v2340_v61, %v2085_v50  ;;  %v2096_v57 = vrot.slane %v2095_v55, 1 }
0x1409   :  { %v2098_v53 = vsel %vm72_vm0, %v2090_v51, 0.0  ;;  %v2097_v59 = vadd.f32 %v2096_v57, %v2095_v55 }
0x140a   :  { %v2099_v54 = vrot.slane %v2098_v53, 4 }
0x140b   :  { %v2112_v1 = vmul.f32 %v2111_v63, %v2097_v59 }
0x140c   :  { %v2100_v6 = vadd.f32 %v2099_v54, %v2098_v53 }
0x140e   :  { %v2101_v11 = vrot.slane %v2100_v6, 2 }
0x1410   :  { %v2102_v58 = vadd.f32 %v2101_v11, %v2100_v6 }
0x1412   :  { %v2103_v60 = vrot.slane %v2102_v58, 1 }
0x1414   :  { %v2104_v0 = vadd.f32 %v2103_v60, %v2102_v58 }
0x1416   :  { %v2113_v3 = vmul.f32 %v2111_v63, %v2104_v0 }
0x1418   :  { %v2119_v14 = vsel %vm2118_vm2, %v2113_v3, %v2112_v1 }
0x1419   :  { %v2122_v4 = vsel %vm2121_vm3, %v2119_v14, 0.0 }
0x141a   :  { %2123 = vadd.xlane.f32.xlu1 %v2122_v4 }
0x148d   :  { %v2124_v7 = vpop.xlane.xlu1 %2123 }
0x148e   :  { %v2125_v8 = vmul.f32 %v2124_v7, %v2593_v21 }
0x1490   :  { %v2127_v9 = vrot.slane %v2125_v8, 1  ;;  %v2130_v47 = vsub.f32 %v2112_v1, %v2125_v8 }
0x1492   :  { %v2131_v15 = vsub.f32 %v2113_v3, %v2127_v9  ;;  %v2132_v2 = vmul.f32 %v2130_v47, %v2130_v47 }
0x1494   :  { %v2133_v43 = vmul.f32 %v2131_v15, %v2131_v15 }
0x1496   :  { %v2136_v16 = vrot.slane %v2133_v43, 7 }
0x1498   :  { %v2137_v17 = vsel %vm2118_vm2, %v2136_v16, %v2132_v2 }
0x1499   :  { %v2139_v18 = vsel %vm2121_vm3, %v2137_v17, 0.0 }
0x149a   :  { %2140 = vadd.xlane.f32.xlu2 %v2139_v18 }
0x150d   :  { %v2141_v44 = vpop.xlane.xlu2 %2140 }
0x150e   :  { %v2142_v22 = vmul.f32 %v2141_v44, %v2593_v21 }
0x1510   :  { %v2143_v23 = vadd.f32 1e-05, %v2142_v22 }
0x1512   :  { %2432 = vrsqrt.f32 %v2143_v23  ;;  %vm2150_vm4 = vweird.f32 %v2143_v23 }
0x1518   :  { %v2433_v24 = vpop.eup %2432 }
0x1519   :  { %v2145_v25 = vmul.f32 %v2433_v24, %v2143_v23  ;;  %vm2151_vm8 = vweird.f32 %v2433_v24 }
0x151a   :  { %vm2152_vm5 = vmor %vm2150_vm4, %vm2151_vm8 }
0x151b   :  { %v2146_v26 = vmul.f32 %v2433_v24, %v2145_v25 }
0x151d   :  { %v2147_v27 = vmul.f32 0.5, %v2146_v26 }
0x151f   :  { %v2148_v28 = vsub.f32 1.5, %v2147_v27 }
0x1521   :  { %v2149_v29 = vmul.f32 %v2433_v24, %v2148_v28 }
0x1523   :  { %v2153_v30 = vsel %vm2152_vm5, %v2433_v24, %v2149_v29 }
0x1524   :  { %v2155_v61 = vrot.slane %v2153_v30, 1  ;;  %v2158_v31 = vmul.f32 %v2153_v30, %v2130_v47 }
0x1526   :  { %v2159_v33 = vmul.f32 %v2155_v61, %v2131_v15  ;;  %v2163_v21 = vmul.f32 %v2341_v32, %v2158_v31 }
0x1528   :  { %v2164_v34 = vmul.f32 %v2341_v32, %v2159_v33  ;;  %v2168_v37 = vadd.f32 %v2342_v35, %v2163_v21 }
0x152a   :  { %v2169_v36 = vadd.f32 %v2342_v35, %v2164_v34 }
0x152c   :  { %v2180_v38 = vrot.slane %v2169_v36, 7 }
0x152e   :  { %v2181_v39 = vsel %vm2118_vm2, %v2180_v38, %v2168_v37 }
0x152f   :  { %2320 = vmatmul.msk.f32.vlgmr.msra.gmra.mxu1 %vm72_vm0, %v2181_v39 }
0x15ac   :  { %v2201_v41 = vpop.f32.mrf.mxu1 }
0x15ad   :  { %v2202_v42 = vadd.f32 %v2343_v40, %v2201_v41 }
0x15af   :  { %2205 = vst.msk [vmem:[#allocation2] sm:$0x3] %vm2204_vm6, %v2202_v42 }
0x15b0   :  { %2216 = dma.vmem_to_hbm [thread:$0]  %s2212_s4, 32, %s2214_s23, [#allocation3]  }
0x15b1   :  { %2458 = dma.done.wait [#allocation3], 32  }
0x15b2   :  { %2459 = vsyncadd [#allocation3], 4294967264 }
0x15b3   :  { %2221 = vsyncpa [#allocation3], 1 }

</bundles_post_ra>
